<compile_context>
chip_gen: v7x
topology: tpu7x:2x2x1
jax: 0.10.0
libtpu: 0.0.40
codegen_flags: <defaults>
</compile_context>

<pallas_src>
import functools

import jax
import jax.numpy as jnp
from jax.experimental import pallas as pl
from jax.experimental.pallas import tpu as pltpu

NEG_SLOPE = 0.2   # PyG GATConv default negative_slope
NEG_INF = -1e30


def _vmem_spec():
    return pl.BlockSpec(memory_space=pltpu.MemorySpace.VMEM)


def _block_att_matrix(asrc, adst):
    """Build the block-diagonal projection A: [H*D, 2H] (host-side).

    (h @ A)[:, :H]  -> per-head <h_head, att_src>
    (h @ A)[:, H:]  -> per-head <h_head, att_dst>
    so one MXU matmul replaces 2*H cross-lane reductions inside the kernel.
    """
    h, d = asrc.shape
    rows = jnp.arange(h * d)
    head = rows // d
    a = jnp.zeros((h * d, 2 * h), jnp.float32)
    a = a.at[rows, head].set(asrc.reshape(-1))
    a = a.at[rows, h + head].set(adst.reshape(-1))
    return a


def _gat_forward_kernel(x_ref, mask_ref, w1_ref, att1_ref, b1_ref,
                        w2_ref, att2_ref, b2_ref, out_ref, h1s_ref,
                        *, heads, nhid, nclass):
    """Fused GAT forward: conv1 -> ELU -> conv2 -> log_softmax, all in VMEM."""
    f32 = jnp.float32
    H, D = heads, nhid
    del nclass  # shapes carry it

    x = x_ref[...].astype(f32)                                   # [N, Fin]
    mask_b = mask_ref[...].astype(f32) != 0.0                    # [N, N] bool (dst, src)

    # ---------------- layer 1: GATConv(nfeat -> nhid, heads=H, concat) -----
    h1 = jnp.dot(x, w1_ref[...], preferred_element_type=f32)     # [N, H*D]   (MXU)
    a1 = jnp.dot(h1, att1_ref[...], preferred_element_type=f32)  # [N, 2H]    (MXU)
    a1t = a1.T                                                   # [2H, N]
    a_src = a1t[:H]                                              # [H, N]
    a_dst = a1t[H:2 * H]                                         # [H, N]

    # batched (all heads at once) masked softmax over source nodes
    e = a_dst[:, :, None] + a_src[:, None, :]                    # [H, N, N]
    e = jnp.where(e > 0, e, NEG_SLOPE * e)                       # leaky_relu
    e = jnp.where(mask_b[None, :, :], e, jnp.float32(NEG_INF))
    m = jnp.max(e, axis=-1, keepdims=True)                       # [H, N, 1]
    p = jnp.exp(e - m)                                           # masked logits -> exp == 0
    inv = pl.reciprocal(jnp.sum(p, axis=-1, keepdims=True), approx=True)
    alpha = p * inv                                              # [H, N, N]

    # per-head aggregation written straight into static column slices
    for hd in range(H):                                          # static unroll (H small)
        hh = h1[:, hd * D:(hd + 1) * D]                          # [N, D]
        h1s_ref[:, hd * D:(hd + 1) * D] = jnp.dot(
            alpha[hd], hh, preferred_element_type=f32)           # [N, D]  (MXU)

    h1a = h1s_ref[...] + b1_ref[...]                             # + bias
    h1a = jnp.where(h1a > 0, h1a, jnp.exp(jnp.minimum(h1a, 0.0)) - 1.0)   # ELU

    # ---------------- layer 2: GATConv(H*D -> nclass, heads=1, mean) -------
    h2 = jnp.dot(h1a, w2_ref[...], preferred_element_type=f32)   # [N, C]
    a2 = jnp.dot(h2, att2_ref[...], preferred_element_type=f32)  # [N, 2]
    e2 = a2[:, 1:2] + a2[:, 0:1].T                               # [N, N]: a_dst[i] + a_src[j]
    e2 = jnp.where(e2 > 0, e2, NEG_SLOPE * e2)
    e2 = jnp.where(mask_b, e2, jnp.float32(NEG_INF))
    m2 = jnp.max(e2, axis=-1, keepdims=True)
    p2 = jnp.exp(e2 - m2)
    inv2 = pl.reciprocal(jnp.sum(p2, axis=-1, keepdims=True), approx=True)
    alpha2 = p2 * inv2

    out2 = jnp.dot(alpha2, h2, preferred_element_type=f32) + b2_ref[...]   # [N, C]

    # ---------------- log_softmax over classes -----------------------------
    mo = jnp.max(out2, axis=-1, keepdims=True)
    z = out2 - mo
    lse = jnp.log(jnp.sum(jnp.exp(z), axis=-1, keepdims=True))
    out_ref[...] = z - lse


@functools.partial(jax.jit, static_argnames=("heads", "nhid", "nclass"))
def gat_forward(x, edge_index, params, *, heads, nhid, nclass):
    """Eval-mode forward of the GAT module (dropout -> identity)."""
    n = x.shape[0]
    src = edge_index[0]
    dst = edge_index[1]
    # Dense mask M[dst, src]; GATConv adds self-loops (weightless here).
    adj = jnp.zeros((n, n), jnp.float32).at[dst, src].set(1.0)
    mask_ds = jnp.maximum(adj, jnp.eye(n, dtype=jnp.float32)).astype(jnp.bfloat16)

    att1 = _block_att_matrix(params["asrc1"], params["adst1"])   # [H*nhid, 2H]
    att2 = _block_att_matrix(params["asrc2"], params["adst2"])   # [nclass, 2]

    kernel = functools.partial(_gat_forward_kernel,
                               heads=heads, nhid=nhid, nclass=nclass)
    return pl.pallas_call(
        kernel,
        out_shape=jax.ShapeDtypeStruct((n, nclass), jnp.float32),
        in_specs=[_vmem_spec()] * 8,
        out_specs=_vmem_spec(),
        scratch_shapes=[pltpu.VMEM((n, heads * nhid), jnp.float32)],
    )(x, mask_ds, params["w1"], att1, params["b1"],
      params["w2"], att2, params["b2"])


def init_params(key, nfeat, nhid, nclass, heads):
    ks = jax.random.split(key, 6)
    glorot = lambda k, shp: (jax.random.uniform(k, shp, jnp.float32, -1.0, 1.0)
                             * jnp.sqrt(6.0 / (shp[-2] + shp[-1])))
    return {
        "w1":    glorot(ks[0], (nfeat, heads * nhid)),
        "asrc1": glorot(ks[1], (heads, nhid)),
        "adst1": glorot(ks[2], (heads, nhid)),
        "b1":    jnp.zeros((1, heads * nhid), jnp.float32),
        "w2":    glorot(ks[3], (heads * nhid, nclass)),
        "asrc2": glorot(ks[4], (1, nclass)),
        "adst2": glorot(ks[5], (1, nclass)),
        "b2":    jnp.zeros((1, nclass), jnp.float32),
    }


if __name__ == "__main__":
    N, NFEAT, NHID, NCLASS, HEADS = 32, 16, 8, 4, 8

    key = jax.random.PRNGKey(0)
    k_x, k_adj, k_p = jax.random.split(key, 3)

    x = jax.random.normal(k_x, (N, NFEAT), jnp.float32)

    # Deterministic random undirected graph (no self-loops in edge_index;
    # GATConv adds them itself).
    a = jax.random.bernoulli(k_adj, 0.2, (N, N))
    a = jnp.logical_or(a, a.T)
    a = jnp.logical_and(a, jnp.logical_not(jnp.eye(N, dtype=bool)))
    rows, cols = jnp.nonzero(a)                               # concrete (outside jit)
    edge_index = jnp.stack([rows, cols]).astype(jnp.int32)    # [2, E], src->dst

    params = init_params(k_p, NFEAT, NHID, NCLASS, HEADS)

    out = gat_forward(x, edge_index, params, heads=HEADS, nhid=NHID, nclass=NCLASS)
    out = jax.block_until_ready(out)

    assert out.shape == (N, NCLASS)
    # rows of log_softmax must sum (in prob space) to 1
    assert bool(jnp.allclose(jnp.sum(jnp.exp(out), axis=1), 1.0, atol=1e-4))
    print("KERNEL_OK")
</pallas_src>

<mosaic_0001>
module attributes {stable_mosaic.version = 11 : i64} {
  func.func @_gat_forward_kernel(%arg0: memref<32x16xf32, #tpu.memory_space<vmem>>, %arg1: memref<32x32xbf16, #tpu.memory_space<vmem>>, %arg2: memref<16x64xf32, #tpu.memory_space<vmem>>, %arg3: memref<64x16xf32, #tpu.memory_space<vmem>>, %arg4: memref<1x64xf32, #tpu.memory_space<vmem>>, %arg5: memref<64x4xf32, #tpu.memory_space<vmem>>, %arg6: memref<4x2xf32, #tpu.memory_space<vmem>>, %arg7: memref<1x4xf32, #tpu.memory_space<vmem>>, %arg8: memref<32x4xf32, #tpu.memory_space<vmem>>, %arg9: memref<32x64xf32, #tpu.memory_space<vmem>>) attributes {dimension_semantics = [], scalar_prefetch = 0 : i64, scratch_operands = 1 : i64, tpu.core_type = #tpu.core_type<tc>} {
    %c0 = arith.constant 0 : index
    %c0_0 = arith.constant 0 : index
    %0 = vector.load %arg0[%c0, %c0_0] : memref<32x16xf32, #tpu.memory_space<vmem>>, vector<32x16xf32>
    %c0_1 = arith.constant 0 : index
    %c0_2 = arith.constant 0 : index
    %1 = vector.load %arg1[%c0_1, %c0_2] : memref<32x32xbf16, #tpu.memory_space<vmem>>, vector<32x32xbf16>
    %2 = arith.extf %1 : vector<32x32xbf16> to vector<32x32xf32>
    %cst = arith.constant 0.000000e+00 : f32
    %3 = vector.broadcast %cst : f32 to vector<32x32xf32>
    %4 = arith.cmpf one, %2, %3 : vector<32x32xf32>
    %c0_3 = arith.constant 0 : index
    %c0_4 = arith.constant 0 : index
    %5 = vector.load %arg2[%c0_3, %c0_4] : memref<16x64xf32, #tpu.memory_space<vmem>>, vector<16x64xf32>
    %cst_5 = arith.constant dense<0.000000e+00> : vector<32x64xf32>
    %6 = tpu.matmul %0, %5, %cst_5 {dimension_numbers = #tpu.dot_dimension_numbers<[1], [0], [0], [1], [0, 0, 1, 1], [], []>} : vector<32x16xf32>, vector<16x64xf32>, vector<32x64xf32> -> vector<32x64xf32>
    %c0_6 = arith.constant 0 : index
    %c0_7 = arith.constant 0 : index
    %7 = vector.load %arg3[%c0_6, %c0_7] : memref<64x16xf32, #tpu.memory_space<vmem>>, vector<64x16xf32>
    %cst_8 = arith.constant dense<0.000000e+00> : vector<32x16xf32>
    %8 = tpu.matmul %6, %7, %cst_8 {dimension_numbers = #tpu.dot_dimension_numbers<[1], [0], [0], [1], [0, 0, 1, 1], [], []>} : vector<32x64xf32>, vector<64x16xf32>, vector<32x16xf32> -> vector<32x16xf32>
    %9 = tpu.transpose %8, [1, 0] : vector<32x16xf32> -> vector<16x32xf32>
    %10 = vector.extract_strided_slice %9 {offsets = [0, 0], sizes = [8, 32], strides = [1, 1]} : vector<16x32xf32> to vector<8x32xf32>
    %11 = vector.extract_strided_slice %9 {offsets = [8, 0], sizes = [8, 32], strides = [1, 1]} : vector<16x32xf32> to vector<8x32xf32>
    %12 = vector.shape_cast %11 : vector<8x32xf32> to vector<8x32x1xf32>
    %13 = vector.shape_cast %10 : vector<8x32xf32> to vector<8x1x32xf32>
    %14 = vector.broadcast %12 : vector<8x32x1xf32> to vector<8x32x32xf32>
    %15 = vector.broadcast %13 : vector<8x1x32xf32> to vector<8x32x32xf32>
    %16 = arith.addf %14, %15 : vector<8x32x32xf32>
    %cst_9 = arith.constant 0.000000e+00 : f32
    %17 = vector.broadcast %cst_9 : f32 to vector<8x32x32xf32>
    %18 = arith.cmpf ogt, %16, %17 : vector<8x32x32xf32>
    %cst_10 = arith.constant 2.000000e-01 : f32
    %19 = vector.broadcast %cst_10 : f32 to vector<8x32x32xf32>
    %20 = arith.mulf %19, %16 : vector<8x32x32xf32>
    %21 = arith.select %18, %16, %20 : vector<8x32x32xi1>, vector<8x32x32xf32>
    %22 = vector.shape_cast %4 : vector<32x32xi1> to vector<1x32x32xi1>
    %cst_11 = arith.constant -1.000000e+30 : f32
    %23 = vector.shape_cast %22 : vector<1x32x32xi1> to vector<1x32x32xi1>
    %24 = vector.broadcast %23 : vector<1x32x32xi1> to vector<8x32x32xi1>
    %25 = vector.broadcast %cst_11 : f32 to vector<8x32x32xf32>
    %26 = arith.select %24, %21, %25 : vector<8x32x32xi1>, vector<8x32x32xf32>
    %cst_12 = arith.constant dense<0xFF800000> : vector<8x32xf32>
    %27 = vector.multi_reduction <maximumf>, %26, %cst_12 [2] : vector<8x32x32xf32> to vector<8x32xf32>
    %28 = vector.shape_cast %27 : vector<8x32xf32> to vector<8x32x1xf32>
    %29 = vector.broadcast %28 : vector<8x32x1xf32> to vector<8x32x32xf32>
    %30 = arith.subf %26, %29 : vector<8x32x32xf32>
    %31 = math.exp %30 : vector<8x32x32xf32>
    %cst_13 = arith.constant dense<0.000000e+00> : vector<8x32xf32>
    %32 = vector.multi_reduction <add>, %31, %cst_13 [2] : vector<8x32x32xf32> to vector<8x32xf32>
    %33 = vector.shape_cast %32 : vector<8x32xf32> to vector<8x32x1xf32>
    %34 = tpu.reciprocal %33 {approx = true} : vector<8x32x1xf32> -> vector<8x32x1xf32>
    %35 = vector.broadcast %34 : vector<8x32x1xf32> to vector<8x32x32xf32>
    %36 = arith.mulf %31, %35 : vector<8x32x32xf32>
    %37 = vector.extract_strided_slice %6 {offsets = [0, 0], sizes = [32, 8], strides = [1, 1]} : vector<32x64xf32> to vector<32x8xf32>
    %38 = vector.extract_strided_slice %36 {offsets = [0, 0, 0], sizes = [1, 32, 32], strides = [1, 1, 1]} : vector<8x32x32xf32> to vector<1x32x32xf32>
    %39 = vector.shape_cast %38 : vector<1x32x32xf32> to vector<32x32xf32>
    %cst_14 = arith.constant dense<0.000000e+00> : vector<32x8xf32>
    %40 = tpu.matmul %39, %37, %cst_14 {dimension_numbers = #tpu.dot_dimension_numbers<[1], [0], [0], [1], [0, 0, 1, 1], [], []>} : vector<32x32xf32>, vector<32x8xf32>, vector<32x8xf32> -> vector<32x8xf32>
    %c0_15 = arith.constant 0 : index
    %c0_16 = arith.constant 0 : index
    %41 = vector.load %arg9[%c0_15, %c0_16] : memref<32x64xf32, #tpu.memory_space<vmem>>, vector<32x8xf32>
    tpu.vector_store %arg9[%c0_15, %c0_16], %40 {strides = array<i32>} : memref<32x64xf32, #tpu.memory_space<vmem>>, vector<32x8xf32>,
    %42 = vector.extract_strided_slice %6 {offsets = [0, 8], sizes = [32, 8], strides = [1, 1]} : vector<32x64xf32> to vector<32x8xf32>
    %43 = vector.extract_strided_slice %36 {offsets = [1, 0, 0], sizes = [1, 32, 32], strides = [1, 1, 1]} : vector<8x32x32xf32> to vector<1x32x32xf32>
    %44 = vector.shape_cast %43 : vector<1x32x32xf32> to vector<32x32xf32>
    %cst_17 = arith.constant dense<0.000000e+00> : vector<32x8xf32>
    %45 = tpu.matmul %44, %42, %cst_17 {dimension_numbers = #tpu.dot_dimension_numbers<[1], [0], [0], [1], [0, 0, 1, 1], [], []>} : vector<32x32xf32>, vector<32x8xf32>, vector<32x8xf32> -> vector<32x8xf32>
    %c0_18 = arith.constant 0 : index
    %c8 = arith.constant 8 : index
    %46 = vector.load %arg9[%c0_18, %c8] : memref<32x64xf32, #tpu.memory_space<vmem>>, vector<32x8xf32>
    tpu.vector_store %arg9[%c0_18, %c8], %45 {strides = array<i32>} : memref<32x64xf32, #tpu.memory_space<vmem>>, vector<32x8xf32>,
    %47 = vector.extract_strided_slice %6 {offsets = [0, 16], sizes = [32, 8], strides = [1, 1]} : vector<32x64xf32> to vector<32x8xf32>
    %48 = vector.extract_strided_slice %36 {offsets = [2, 0, 0], sizes = [1, 32, 32], strides = [1, 1, 1]} : vector<8x32x32xf32> to vector<1x32x32xf32>
    %49 = vector.shape_cast %48 : vector<1x32x32xf32> to vector<32x32xf32>
    %cst_19 = arith.constant dense<0.000000e+00> : vector<32x8xf32>
    %50 = tpu.matmul %49, %47, %cst_19 {dimension_numbers = #tpu.dot_dimension_numbers<[1], [0], [0], [1], [0, 0, 1, 1], [], []>} : vector<32x32xf32>, vector<32x8xf32>, vector<32x8xf32> -> vector<32x8xf32>
    %c0_20 = arith.constant 0 : index
    %c16 = arith.constant 16 : index
    %51 = vector.load %arg9[%c0_20, %c16] : memref<32x64xf32, #tpu.memory_space<vmem>>, vector<32x8xf32>
    tpu.vector_store %arg9[%c0_20, %c16], %50 {strides = array<i32>} : memref<32x64xf32, #tpu.memory_space<vmem>>, vector<32x8xf32>,
    %52 = vector.extract_strided_slice %6 {offsets = [0, 24], sizes = [32, 8], strides = [1, 1]} : vector<32x64xf32> to vector<32x8xf32>
    %53 = vector.extract_strided_slice %36 {offsets = [3, 0, 0], sizes = [1, 32, 32], strides = [1, 1, 1]} : vector<8x32x32xf32> to vector<1x32x32xf32>
    %54 = vector.shape_cast %53 : vector<1x32x32xf32> to vector<32x32xf32>
    %cst_21 = arith.constant dense<0.000000e+00> : vector<32x8xf32>
    %55 = tpu.matmul %54, %52, %cst_21 {dimension_numbers = #tpu.dot_dimension_numbers<[1], [0], [0], [1], [0, 0, 1, 1], [], []>} : vector<32x32xf32>, vector<32x8xf32>, vector<32x8xf32> -> vector<32x8xf32>
    %c0_22 = arith.constant 0 : index
    %c24 = arith.constant 24 : index
    %56 = vector.load %arg9[%c0_22, %c24] : memref<32x64xf32, #tpu.memory_space<vmem>>, vector<32x8xf32>
    tpu.vector_store %arg9[%c0_22, %c24], %55 {strides = array<i32>} : memref<32x64xf32, #tpu.memory_space<vmem>>, vector<32x8xf32>,
    %57 = vector.extract_strided_slice %6 {offsets = [0, 32], sizes = [32, 8], strides = [1, 1]} : vector<32x64xf32> to vector<32x8xf32>
    %58 = vector.extract_strided_slice %36 {offsets = [4, 0, 0], sizes = [1, 32, 32], strides = [1, 1, 1]} : vector<8x32x32xf32> to vector<1x32x32xf32>
    %59 = vector.shape_cast %58 : vector<1x32x32xf32> to vector<32x32xf32>
    %cst_23 = arith.constant dense<0.000000e+00> : vector<32x8xf32>
    %60 = tpu.matmul %59, %57, %cst_23 {dimension_numbers = #tpu.dot_dimension_numbers<[1], [0], [0], [1], [0, 0, 1, 1], [], []>} : vector<32x32xf32>, vector<32x8xf32>, vector<32x8xf32> -> vector<32x8xf32>
    %c0_24 = arith.constant 0 : index
    %c32 = arith.constant 32 : index
    %61 = vector.load %arg9[%c0_24, %c32] : memref<32x64xf32, #tpu.memory_space<vmem>>, vector<32x8xf32>
    tpu.vector_store %arg9[%c0_24, %c32], %60 {strides = array<i32>} : memref<32x64xf32, #tpu.memory_space<vmem>>, vector<32x8xf32>,
    %62 = vector.extract_strided_slice %6 {offsets = [0, 40], sizes = [32, 8], strides = [1, 1]} : vector<32x64xf32> to vector<32x8xf32>
    %63 = vector.extract_strided_slice %36 {offsets = [5, 0, 0], sizes = [1, 32, 32], strides = [1, 1, 1]} : vector<8x32x32xf32> to vector<1x32x32xf32>
    %64 = vector.shape_cast %63 : vector<1x32x32xf32> to vector<32x32xf32>
    %cst_25 = arith.constant dense<0.000000e+00> : vector<32x8xf32>
    %65 = tpu.matmul %64, %62, %cst_25 {dimension_numbers = #tpu.dot_dimension_numbers<[1], [0], [0], [1], [0, 0, 1, 1], [], []>} : vector<32x32xf32>, vector<32x8xf32>, vector<32x8xf32> -> vector<32x8xf32>
    %c0_26 = arith.constant 0 : index
    %c40 = arith.constant 40 : index
    %66 = vector.load %arg9[%c0_26, %c40] : memref<32x64xf32, #tpu.memory_space<vmem>>, vector<32x8xf32>
    tpu.vector_store %arg9[%c0_26, %c40], %65 {strides = array<i32>} : memref<32x64xf32, #tpu.memory_space<vmem>>, vector<32x8xf32>,
    %67 = vector.extract_strided_slice %6 {offsets = [0, 48], sizes = [32, 8], strides = [1, 1]} : vector<32x64xf32> to vector<32x8xf32>
    %68 = vector.extract_strided_slice %36 {offsets = [6, 0, 0], sizes = [1, 32, 32], strides = [1, 1, 1]} : vector<8x32x32xf32> to vector<1x32x32xf32>
    %69 = vector.shape_cast %68 : vector<1x32x32xf32> to vector<32x32xf32>
    %cst_27 = arith.constant dense<0.000000e+00> : vector<32x8xf32>
    %70 = tpu.matmul %69, %67, %cst_27 {dimension_numbers = #tpu.dot_dimension_numbers<[1], [0], [0], [1], [0, 0, 1, 1], [], []>} : vector<32x32xf32>, vector<32x8xf32>, vector<32x8xf32> -> vector<32x8xf32>
    %c0_28 = arith.constant 0 : index
    %c48 = arith.constant 48 : index
    %71 = vector.load %arg9[%c0_28, %c48] : memref<32x64xf32, #tpu.memory_space<vmem>>, vector<32x8xf32>
    tpu.vector_store %arg9[%c0_28, %c48], %70 {strides = array<i32>} : memref<32x64xf32, #tpu.memory_space<vmem>>, vector<32x8xf32>,
    %72 = vector.extract_strided_slice %6 {offsets = [0, 56], sizes = [32, 8], strides = [1, 1]} : vector<32x64xf32> to vector<32x8xf32>
    %73 = vector.extract_strided_slice %36 {offsets = [7, 0, 0], sizes = [1, 32, 32], strides = [1, 1, 1]} : vector<8x32x32xf32> to vector<1x32x32xf32>
    %74 = vector.shape_cast %73 : vector<1x32x32xf32> to vector<32x32xf32>
    %cst_29 = arith.constant dense<0.000000e+00> : vector<32x8xf32>
    %75 = tpu.matmul %74, %72, %cst_29 {dimension_numbers = #tpu.dot_dimension_numbers<[1], [0], [0], [1], [0, 0, 1, 1], [], []>} : vector<32x32xf32>, vector<32x8xf32>, vector<32x8xf32> -> vector<32x8xf32>
    %c0_30 = arith.constant 0 : index
    %c56 = arith.constant 56 : index
    %76 = vector.load %arg9[%c0_30, %c56] : memref<32x64xf32, #tpu.memory_space<vmem>>, vector<32x8xf32>
    tpu.vector_store %arg9[%c0_30, %c56], %75 {strides = array<i32>} : memref<32x64xf32, #tpu.memory_space<vmem>>, vector<32x8xf32>,
    %c0_31 = arith.constant 0 : index
    %c0_32 = arith.constant 0 : index
    %77 = vector.load %arg9[%c0_31, %c0_32] : memref<32x64xf32, #tpu.memory_space<vmem>>, vector<32x64xf32>
    %c0_33 = arith.constant 0 : index
    %c0_34 = arith.constant 0 : index
    %78 = vector.load %arg4[%c0_33, %c0_34] : memref<1x64xf32, #tpu.memory_space<vmem>>, vector<1x64xf32>
    %79 = vector.broadcast %78 : vector<1x64xf32> to vector<32x64xf32>
    %80 = arith.addf %77, %79 : vector<32x64xf32>
    %cst_35 = arith.constant 0.000000e+00 : f32
    %81 = vector.broadcast %cst_35 : f32 to vector<32x64xf32>
    %82 = arith.cmpf ogt, %80, %81 : vector<32x64xf32>
    %cst_36 = arith.constant 0.000000e+00 : f32
    %83 = vector.broadcast %cst_36 : f32 to vector<32x64xf32>
    %84 = arith.minimumf %80, %83 : vector<32x64xf32>
    %85 = math.exp %84 : vector<32x64xf32>
    %cst_37 = arith.constant 1.000000e+00 : f32
    %86 = vector.broadcast %cst_37 : f32 to vector<32x64xf32>
    %87 = arith.subf %85, %86 : vector<32x64xf32>
    %88 = arith.select %82, %80, %87 : vector<32x64xi1>, vector<32x64xf32>
    %c0_38 = arith.constant 0 : index
    %c0_39 = arith.constant 0 : index
    %89 = vector.load %arg5[%c0_38, %c0_39] : memref<64x4xf32, #tpu.memory_space<vmem>>, vector<64x4xf32>
    %cst_40 = arith.constant dense<0.000000e+00> : vector<32x4xf32>
    %90 = tpu.matmul %88, %89, %cst_40 {dimension_numbers = #tpu.dot_dimension_numbers<[1], [0], [0], [1], [0, 0, 1, 1], [], []>} : vector<32x64xf32>, vector<64x4xf32>, vector<32x4xf32> -> vector<32x4xf32>
    %c0_41 = arith.constant 0 : index
    %c0_42 = arith.constant 0 : index
    %91 = vector.load %arg6[%c0_41, %c0_42] : memref<4x2xf32, #tpu.memory_space<vmem>>, vector<4x2xf32>
    %cst_43 = arith.constant dense<0.000000e+00> : vector<32x2xf32>
    %92 = tpu.matmul %90, %91, %cst_43 {dimension_numbers = #tpu.dot_dimension_numbers<[1], [0], [0], [1], [0, 0, 1, 1], [], []>} : vector<32x4xf32>, vector<4x2xf32>, vector<32x2xf32> -> vector<32x2xf32>
    %93 = vector.extract_strided_slice %92 {offsets = [0, 1], sizes = [32, 1], strides = [1, 1]} : vector<32x2xf32> to vector<32x1xf32>
    %94 = vector.extract_strided_slice %92 {offsets = [0, 0], sizes = [32, 1], strides = [1, 1]} : vector<32x2xf32> to vector<32x1xf32>
    %95 = tpu.transpose %94, [1, 0] : vector<32x1xf32> -> vector<1x32xf32>
    %96 = vector.broadcast %93 : vector<32x1xf32> to vector<32x32xf32>
    %97 = vector.broadcast %95 : vector<1x32xf32> to vector<32x32xf32>
    %98 = arith.addf %96, %97 : vector<32x32xf32>
    %cst_44 = arith.constant 0.000000e+00 : f32
    %99 = vector.broadcast %cst_44 : f32 to vector<32x32xf32>
    %100 = arith.cmpf ogt, %98, %99 : vector<32x32xf32>
    %cst_45 = arith.constant 2.000000e-01 : f32
    %101 = vector.broadcast %cst_45 : f32 to vector<32x32xf32>
    %102 = arith.mulf %101, %98 : vector<32x32xf32>
    %103 = arith.select %100, %98, %102 : vector<32x32xi1>, vector<32x32xf32>
    %cst_46 = arith.constant -1.000000e+30 : f32
    %104 = vector.broadcast %cst_46 : f32 to vector<32x32xf32>
    %105 = arith.select %4, %103, %104 : vector<32x32xi1>, vector<32x32xf32>
    %cst_47 = arith.constant dense<0xFF800000> : vector<32xf32>
    %106 = vector.multi_reduction <maximumf>, %105, %cst_47 [1] : vector<32x32xf32> to vector<32xf32>
    %107 = vector.shape_cast %106 : vector<32xf32> to vector<32x1xf32>
    %108 = vector.broadcast %107 : vector<32x1xf32> to vector<32x32xf32>
    %109 = arith.subf %105, %108 : vector<32x32xf32>
    %110 = math.exp %109 : vector<32x32xf32>
    %cst_48 = arith.constant dense<0.000000e+00> : vector<32xf32>
    %111 = vector.multi_reduction <add>, %110, %cst_48 [1] : vector<32x32xf32> to vector<32xf32>
    %112 = vector.shape_cast %111 : vector<32xf32> to vector<32x1xf32>
    %113 = tpu.reciprocal %112 {approx = true} : vector<32x1xf32> -> vector<32x1xf32>
    %114 = vector.broadcast %113 : vector<32x1xf32> to vector<32x32xf32>
    %115 = arith.mulf %110, %114 : vector<32x32xf32>
    %cst_49 = arith.constant dense<0.000000e+00> : vector<32x4xf32>
    %116 = tpu.matmul %115, %90, %cst_49 {dimension_numbers = #tpu.dot_dimension_numbers<[1], [0], [0], [1], [0, 0, 1, 1], [], []>} : vector<32x32xf32>, vector<32x4xf32>, vector<32x4xf32> -> vector<32x4xf32>
    %c0_50 = arith.constant 0 : index
    %c0_51 = arith.constant 0 : index
    %117 = vector.load %arg7[%c0_50, %c0_51] : memref<1x4xf32, #tpu.memory_space<vmem>>, vector<1x4xf32>
    %118 = vector.broadcast %117 : vector<1x4xf32> to vector<32x4xf32>
    %119 = arith.addf %116, %118 : vector<32x4xf32>
    %cst_52 = arith.constant dense<0xFF800000> : vector<32xf32>
    %120 = vector.multi_reduction <maximumf>, %119, %cst_52 [1] : vector<32x4xf32> to vector<32xf32>
    %121 = vector.shape_cast %120 : vector<32xf32> to vector<32x1xf32>
    %122 = vector.broadcast %121 : vector<32x1xf32> to vector<32x4xf32>
    %123 = arith.subf %119, %122 : vector<32x4xf32>
    %124 = math.exp %123 : vector<32x4xf32>
    %cst_53 = arith.constant dense<0.000000e+00> : vector<32xf32>
    %125 = vector.multi_reduction <add>, %124, %cst_53 [1] : vector<32x4xf32> to vector<32xf32>
    %126 = vector.shape_cast %125 : vector<32xf32> to vector<32x1xf32>
    %127 = math.log %126 : vector<32x1xf32>
    %128 = vector.broadcast %127 : vector<32x1xf32> to vector<32x4xf32>
    %129 = arith.subf %123, %128 : vector<32x4xf32>
    %c0_54 = arith.constant 0 : index
    %c0_55 = arith.constant 0 : index
    %130 = vector.load %arg8[%c0_54, %c0_55] : memref<32x4xf32, #tpu.memory_space<vmem>>, vector<32x4xf32>
    tpu.vector_store %arg8[%c0_54, %c0_55], %129 {strides = array<i32>} : memref<32x4xf32, #tpu.memory_space<vmem>>, vector<32x4xf32>,
    return
  }
}

</mosaic_0001>

<bundles_post_ra>
// kernel: gat_forward.1
= control target key start
LH: loop header
LB: loop body
LE: loop exit
PB: predicated region body
PF: predicated region fallthrough
CT: control target
= control target key end

     0   :  { %vm47_vm0 = vcmask 130048   ;;  %vm153_vm1 = vcmask 523264   ;;  %s3315_s10 = smov 96   ;;  %s3316_s11 = smov 112   ;;  %v283_v49 = vlaneseq  ;;  %vm693_vm4 = vcmask 261120   ;;  %s4101_s2 = inlined_call_operand.vmem [shape: f32[16,64], index: 2, kind: input, shape index: {}]   ;;  %s4102_s0 = inlined_call_operand.vmem [shape: f32[32,16], index: 0, kind: input, shape index: {}]   ;;  %s4103_s3 = inlined_call_operand.vmem [shape: f32[64,16], index: 3, kind: input, shape index: {}]   ;;  %s4104_s1 = inlined_call_operand.vmem [shape: bf16[32,32], index: 1, kind: input, shape index: {}]   ;;  %s4105_s5 = inlined_call_operand.vmem [shape: f32[64,4], index: 5, kind: input, shape index: {}]   ;;  %s4106_s6 = inlined_call_operand.vmem [shape: f32[4,2], index: 6, kind: input, shape index: {}]   ;;  %s4107_s4 = inlined_call_operand.vmem [shape: f32[1,64], index: 4, kind: input, shape index: {}]   ;;  %s4108_s7 = inlined_call_operand.vmem [shape: f32[1,4], index: 7, kind: input, shape index: {}]   ;;  %s4109_s8 = inlined_call_operand.vmem [shape: f32[32,4], index: 8, kind: output, shape index: {}]  }
   0x1   :  { %v45_v0 = vld [vmem:[%s4101_s2] sm:$0xff]  ;;  %v46_v1 = vld [vmem:[%s4101_s2 + $0x8] sm:$0xff]  ;;  %v147_v6 = vld [vmem:[%s4103_s3 + $0x10] sm:$0xff]  ;;  %s3317_s12 = smov 88   ;;  %s3320_s2 = smov 80  }
   0x2   :  { %v29_v2 = vld [vmem:[%s4102_s0] sm:$0xff]  ;;  %v2948_v3 = vpack.c.bf16 %v46_v1, %v45_v0  ;;  %v146_v5 = vld [vmem:[%s4103_s3 + $0x8] sm:$0xff]  ;;  %v148_v8 = vld [vmem:[%s4103_s3 + $0x18] sm:$0xff]  ;;  %v284_v50 = vshrl.u32 %v283_v49, 7  ;;  %s3321_s17 = smov 16   ;;  %s3322_s18 = smov 8  }
   0x3   :  { %2764 = vmatprep.mubr.msk.f32.mxu0 %vm47_vm0, %v29_v2  ;;  %v145_v4 = vld [vmem:[%s4103_s3] sm:$0xff]  ;;  %v30_v9 = vld [vmem:[%s4102_s0 + $0x8] sm:$0xff]  ;;  %v2956_v10 = vpack.c.bf16 %v148_v8, %v147_v6  ;;  %v31_v13 = vld [vmem:[%s4102_s0 + $0x10] sm:$0xff]  ;;  %v3318_v6 = vmov 1966171168   ;;  %s3323_s19 = smov 32  }
   0x4   :  { %2949 = vmatprep.subr.bf16.mxu0 %v2948_v3  ;;  %v2952_v7 = vpack.c.bf16 %v146_v5, %v145_v4  ;;  %v149_v11 = vld [vmem:[%s4103_s3 + $0x20] sm:$0xff]  ;;  %v150_v12 = vld [vmem:[%s4103_s3 + $0x28] sm:$0xff]  ;;  %v32_v15 = vld [vmem:[%s4102_s0 + $0x18] sm:$0xff]  ;;  %s3313_s0 = smov 104   ;;  %v3450_v52 = vsub.s32 0, %v284_v50  ;;  %v304_v53 = vsub.s32 1, %v284_v50 }
   0x5   :  { %2951 = vmatpush3.bf16.msra.mxu0 %v2948_v3  ;;  %v2960_v14 = vpack.c.bf16 %v150_v12, %v149_v11  ;;  %v151_v16 = vld [vmem:[%s4103_s3 + $0x30] sm:$0xff]  ;;  %v152_v17 = vld [vmem:[%s4103_s3 + $0x38] sm:$0xff]  ;;  %s3314_s3 = smov 120   ;;  %v361_v57 = vsub.s32 4, %v284_v50  ;;  %v380_v59 = vsub.s32 5, %v284_v50  ;;  %v399_v61 = vsub.s32 6, %v284_v50 }
   0x6   :  { %2953 = vmatprep.subr.bf16.mxu1 %v2952_v7  ;;  %v2964_v18 = vpack.c.bf16 %v152_v17, %v151_v16  ;;  %v418_v63 = vsub.s32 7, %v284_v50  ;;  %v323_v1 = vsub.s32 2, %v284_v50  ;;  %v342_v3 = vsub.s32 3, %v284_v50  ;;  %s3324_s20 = smov 24   ;;  %s3325_s21 = smov 48  }
   0x7   :  { %2955 = vmatpush3.bf16.msra.mxu1 %v2952_v7  ;;  %v438_v7 = vunpack.c.l.s4 %v3318_v6  ;;  %s3326_s22 = smov 40   ;;  %s3327_s29 = smov 56  }
   0x8   :  { %2765 = vmatmul.mubr.msk.f32.vlgmr.msra.gmra.mrb[0].mxu0 %vm47_vm0, %v30_v9  ;;  %2957 = vmatprep.subr.bf16.mxu1 %v2956_v10 }
   0x9   :  { %2767 = vmatprep.mubr.msk.f32.mxu0 %vm47_vm0, %v31_v13  ;;  %v439_v8 = vunpack.c.0.s8 %v438_v7 }
   0xb   :  { %2959 = vmatpush3.bf16.msra.mxu1 %v2956_v10  ;;  %v3457_v10 = vsub.s32 %v439_v8, %v284_v50 }
   0xc   :  { %2768 = vmatmul.mubr.msk.f32.gmra.mrb[2].mxu0 %vm47_vm0, %v32_v15  ;;  %2961 = vmatprep.subr.bf16.mxu1 %v2960_v14  ;;  %v2645_v15 = vld [vmem:[%s4104_s1] sm:$0xff]  }
   0xf   :  { %2963 = vmatpush3.bf16.msra.mxu1 %v2960_v14 }
  0x10   :  { %2965 = vmatprep.subr.bf16.mxu1 %v2964_v18 }
  0x13   :  { %2967 = vmatpush3.bf16.msra.mxu1 %v2964_v18  ;;  %v2646_v18 = vunpack.c.l.bf16 %v2645_v15 }
  0x15   :  { %vm3476_vm2 = vcmp.ne.f32.partialorder %v2646_v18, 0.0 }
  0xdb   :  { %v2766_v19 = vpop.f32.mrb[0].mxu0 }
  0xdc   :  { %v126_v20 = vpop.f32.mrb[1].mxu0 }
  0xdd   :  { %2786 = vmatprep.mubr.msk.f32.mxu1 %vm153_vm1, %v126_v20  ;;  %v3421_v21 = vpack.i.bf16 %v2766_v19, %v126_v20  ;;  %v2968_v22 = vpack.c.bf16 %v2766_v19, %v126_v20 }
  0xde   :  { %2787 = vmatmul.mubr.msk.f32.vlgmr.msra.gmra.mrb[0].mxu1 %vm153_vm1, %v2766_v19 }
  0xdf   :  { %3084 = vrot.lane.b32.xlu1 %v3421_v21, %s3313_s0  ;;  %3074 = vrot.lane.b32.xlu0 %v3421_v21, %s3314_s3  ;;  %v2769_v23 = vpop.f32.mrb[2].mxu0 }
  0xe0   :  { %2969 = vmatprep.subr.bf16.mxu0 %v2968_v22  ;;  %v136_v24 = vpop.f32.mrb[3].mxu0 }
  0xe1   :  { %2971 = vmatpush3.bf16.msra.mxu0 %v2968_v22  ;;  %2789 = vmatprep.mubr.msk.f32.mxu1 %vm153_vm1, %v136_v24  ;;  %v2972_v25 = vpack.c.bf16 %v2769_v23, %v136_v24  ;;  %v3427_v26 = vpack.i.bf16 %v2769_v23, %v136_v24 }
  0xe2   :  { %2790 = vmatmul.mubr.msk.f32.gmra.mrb[2].mxu1 %vm153_vm1, %v2769_v23 }
  0xe3   :  { %3089 = vrot.lane.b32.xlu1 %v3421_v21, %s3315_s10  ;;  %3079 = vrot.lane.b32.xlu0 %v3421_v21, %s3316_s11 }
  0xe4   :  { %2973 = vmatprep.subr.bf16.mxu0 %v2972_v25 }
  0xe5   :  { %2975 = vmatpush3.bf16.msra.mxu0 %v2972_v25  ;;  %v2647_v25 = vunpack.c.h.bf16 %v2645_v15 }
  0xe7   :  { %3094 = vrot.lane.b32.xlu1 %v3421_v21, %s3317_s12  ;;  %3104 = vrot.lane.b32.xlu0 %v3427_v26, %s3316_s11  ;;  %vm3491_vm5 = vcmp.ne.f32.partialorder %v2647_v25, 0.0 }
  0xeb   :  { %3114 = vrot.lane.b32.xlu0 %v3427_v26, %s3315_s10  ;;  %3099 = vrot.lane.b32.xlu1 %v3427_v26, %s3314_s3 }
  0xef   :  { %3109 = vrot.lane.b32.xlu1 %v3427_v26, %s3313_s0 }
  0xf3   :  { %3119 = vrot.lane.b32.xlu1 %v3427_v26, %s3317_s12 }
 0x151   :  { %v3438_v27 = vpop.permute.xlu1 %3084  ;;  %v3075_v28 = vpop.permute.xlu0 %3074 }
 0x152   :  { %v3077_v29 = vunpack.i.h.bf16 %v3075_v28  ;;  %v3076_v30 = vunpack.i.l.bf16 %v3075_v28  ;;  %v2652_v28 = vld [vmem:[%s4104_s1 + $0x8] sm:$0xff]   ;;  %s3319_s1 = smov 72  }
 0x153   :  { %v2651_v50 = vunpack.c.h.bf16 %v2652_v28 }
 0x154   :  { %v3440_v31 = vpack.c.bf16 %v3077_v29, %v3076_v30 }
 0x155   :  { %v3080_v32 = vpop.permute.xlu0 %3079  ;;  %v3090_v35 = vpop.permute.xlu1 %3089  ;;  %vm3511_vm10 = vcmp.ne.f32.partialorder %v2651_v50, 0.0 }
 0x156   :  { %v3082_v33 = vunpack.i.h.bf16 %v3080_v32  ;;  %v3081_v34 = vunpack.i.l.bf16 %v3080_v32  ;;  %2977 = vmatprep.subr.bf16.mxu0 %v3440_v31  ;;  %v3092_v38 = vunpack.i.h.bf16 %v3090_v35  ;;  %v3091_v39 = vunpack.i.l.bf16 %v3090_v35 }
 0x158   :  { %v2984_v36 = vpack.c.bf16 %v3082_v33, %v3081_v34  ;;  %v3443_v43 = vpack.c.bf16 %v3092_v38, %v3091_v39 }
 0x159   :  { %v3105_v37 = vpop.permute.xlu0 %3104  ;;  %v3453_v5 = vpop.permute.xlu1 %3094 }
 0x15a   :  { %v3107_v40 = vunpack.i.h.bf16 %v3105_v37  ;;  %v3106_v41 = vunpack.i.l.bf16 %v3105_v37  ;;  %2985 = vmatprep.subr.bf16.mxu1 %v2984_v36 }
 0x15b   :  { %2987 = vmatpush3.bf16.msra.mxu1 %v2984_v36  ;;  %v2650_v36 = vunpack.c.l.bf16 %v2652_v28 }
 0x15c   :  { %v2988_v42 = vpack.c.bf16 %v3107_v40, %v3106_v41 }
 0x15d   :  { %v3446_v48 = vpop.permute.xlu0 %3114  ;;  %v3455_v9 = vpop.permute.xlu1 %3099  ;;  %vm3499_vm7 = vcmp.ne.f32.partialorder %v2650_v36, 0.0 }
 0x15e   :  { %2989 = vmatprep.subr.bf16.mxu1 %v2988_v42 }
 0x15f   :  { %2991 = vmatpush3.bf16.msra.mxu1 %v2988_v42 }
 0x160   :  { %3001 = vmatprep.subr.bf16.mxu1 %v3443_v43 }
 0x161   :  { %v3459_v11 = vpop.permute.xlu1 %3109 }
 0x165   :  { %v3466_v14 = vpop.permute.xlu1 %3119 }
 0x1b1   :  { %v2788_v44 = vpop.f32.mrb[0].mxu1 }
 0x1b2   :  { %v232_v45 = vpop.f32.mrb[1].mxu1 }
 0x1b3   :  { %251 = vxpose.xlu0.b32.start [1/4] (short) (narrow) %v232_v45, 16 }
 0x1b5   :  { %v2791_v46 = vpop.f32.mrb[2].mxu1 }
 0x1b6   :  { %v242_v47 = vpop.f32.mrb[3].mxu1 }
 0x1b7   :  { %252 = vxpose.xlu0.b32.cont [2/4] (short) (narrow) %v2788_v44, 16 }
 0x1bb   :  { %253 = vxpose.xlu0.b32.cont [3/4] (short) (narrow) %v242_v47, 16 }
 0x1bf   :  { %254 = vxpose.xlu0.b32.end [4/4] (short) (narrow) %v2791_v46, 16 }
 0x233   :  { %v3448_v51 = vpop.trf.xlu0 }
 0x234   :  { %v443_v12 = vrot.slane %v3448_v51, %v3457_v10 }
 0x236   :  { %v3464_v13 = vrot.slane %v443_v12, %v3457_v10  ;;  %v451_v16 = vcombine.high %v443_v12, %v443_v12 }
 0x237   :  { %v268_v54 = vpop.trf.xlu0 }
 0x238   :  { %v305_v55 = vrot.slane %v268_v54, %v304_v53  ;;  %v286_v56 = vrot.slane %v268_v54, %v3450_v52  ;;  %v362_v58 = vrot.slane %v268_v54, %v361_v57  ;;  %v381_v60 = vrot.slane %v268_v54, %v380_v59 }
 0x239   :  { %v400_v62 = vrot.slane %v268_v54, %v399_v61  ;;  %v419_v0 = vrot.slane %v268_v54, %v418_v63  ;;  %v324_v2 = vrot.slane %v268_v54, %v323_v1  ;;  %v343_v4 = vrot.slane %v268_v54, %v342_v3 }
 0x23a   :  { %307 = vbcast.lane.b32.xlu0 %v305_v55, 256  ;;  %288 = vbcast.lane.b32.xlu1 %v286_v56, 256  ;;  %v488_v17 = vrot.slane %v3464_v13, %v3450_v52  ;;  %v3474_v22 = vrot.slane %v451_v16, %v3457_v10  ;;  %v481_v12 = vcombine.high %v3464_v13, %v3464_v13 }
 0x23c   :  { %v492_v33 = vrot.slane %v3474_v22, %v3450_v52  ;;  %v496_v25 = vrot.slane %v481_v12, %v3450_v52 }
 0x23e   :  { %364 = vbcast.lane.b32.xlu0 %v362_v58, 256  ;;  %292 = vbcast.lane.b32.xlu1 %v286_v56, 264 }
 0x242   :  { %383 = vbcast.lane.b32.xlu0 %v381_v60, 256  ;;  %296 = vbcast.lane.b32.xlu1 %v286_v56, 272 }
 0x246   :  { %372 = vbcast.lane.b32.xlu0 %v362_v58, 272  ;;  %300 = vbcast.lane.b32.xlu1 %v286_v56, 280 }
 0x24a   :  { %391 = vbcast.lane.b32.xlu0 %v381_v60, 272  ;;  %311 = vbcast.lane.b32.xlu1 %v305_v55, 264 }
 0x24e   :  { %402 = vbcast.lane.b32.xlu0 %v400_v62, 256  ;;  %315 = vbcast.lane.b32.xlu1 %v305_v55, 272 }
 0x252   :  { %421 = vbcast.lane.b32.xlu0 %v419_v0, 256  ;;  %319 = vbcast.lane.b32.xlu1 %v305_v55, 280 }
 0x256   :  { %410 = vbcast.lane.b32.xlu0 %v400_v62, 272  ;;  %326 = vbcast.lane.b32.xlu1 %v324_v2, 256 }
 0x25a   :  { %429 = vbcast.lane.b32.xlu0 %v419_v0, 272  ;;  %330 = vbcast.lane.b32.xlu1 %v324_v2, 264 }
 0x25e   :  { %345 = vbcast.lane.b32.xlu1 %v343_v4, 256 }
 0x262   :  { %349 = vbcast.lane.b32.xlu1 %v343_v4, 264 }
 0x266   :  { %334 = vbcast.lane.b32.xlu1 %v324_v2, 272 }
 0x26a   :  { %338 = vbcast.lane.b32.xlu1 %v324_v2, 280 }
 0x26e   :  { %353 = vbcast.lane.b32.xlu1 %v343_v4, 272 }
 0x272   :  { %357 = vbcast.lane.b32.xlu1 %v343_v4, 280 }
 0x276   :  { %368 = vbcast.lane.b32.xlu1 %v362_v58, 264 }
 0x27a   :  { %387 = vbcast.lane.b32.xlu1 %v381_v60, 264 }
 0x27e   :  { %376 = vbcast.lane.b32.xlu1 %v362_v58, 280 }
 0x282   :  { %395 = vbcast.lane.b32.xlu1 %v381_v60, 280 }
 0x286   :  { %406 = vbcast.lane.b32.xlu1 %v400_v62, 264 }
 0x28a   :  { %425 = vbcast.lane.b32.xlu1 %v419_v0, 264 }
 0x28e   :  { %414 = vbcast.lane.b32.xlu1 %v400_v62, 280 }
 0x292   :  { %433 = vbcast.lane.b32.xlu1 %v419_v0, 280 }
 0x2ac   :  { %v289_v19 = vpop.permute.xlu1 %288  ;;  %v308_v34 = vpop.permute.xlu0 %307 }
 0x2ad   :  { %v525_v20 = vadd.f32 %v488_v17, %v289_v19  ;;  %v529_v41 = vadd.f32 %v492_v33, %v308_v34 }
 0x2af   :  { %v589_v23 = vmul.f32 0.2, %v525_v20  ;;  %vm557_vm3 = vcmp.gt.f32.partialorder %v525_v20, 0.0  ;;  %v593_v54 = vmul.f32 0.2, %v529_v41  ;;  %vm561_vm9 = vcmp.gt.f32.partialorder %v529_v41, 0.0 }
 0x2b0   :  { %v293_v29 = vpop.permute.xlu1 %292 }
 0x2b1   :  { %v526_v30 = vadd.f32 %v488_v17, %v293_v29  ;;  %v621_v32 = vsel %vm557_vm3, %v525_v20, %v589_v23  ;;  %v625_v0 = vsel %vm561_vm9, %v529_v41, %v593_v54 }
 0x2b2   :  { %v3487_v35 = vsel %vm3476_vm2, %v621_v32, -1e+30  ;;  %v3523_v6 = vsel %vm3476_vm2, %v625_v0, -1e+30 }
 0x2b3   :  { %v590_v37 = vmul.f32 0.2, %v526_v30  ;;  %v694_v38 = vsel %vm693_vm4, %v3487_v35, -inf  ;;  %vm558_vm6 = vcmp.gt.f32.partialorder %v526_v30, 0.0 }
 0x2b4   :  { %695 = vmax.xlane.f32.xlu0 %v694_v38  ;;  %v297_v40 = vpop.permute.xlu1 %296 }
 0x2b5   :  { %v527_v42 = vadd.f32 %v488_v17, %v297_v40  ;;  %v622_v44 = vsel %vm558_vm6, %v526_v30, %v590_v37  ;;  %v365_v40 = vpop.permute.xlu0 %364 }
 0x2b6   :  { %v3497_v45 = vsel %vm3491_vm5, %v622_v44, -1e+30 }
 0x2b7   :  { %v591_v47 = vmul.f32 0.2, %v527_v42  ;;  %v697_v49 = vsel %vm693_vm4, %v3497_v45, -inf  ;;  %vm559_vm8 = vcmp.gt.f32.partialorder %v527_v42, 0.0 }
 0x2b8   :  { %698 = vmax.xlane.f32.xlu1 %v697_v49  ;;  %v301_v53 = vpop.permute.xlu1 %300 }
 0x2b9   :  { %v528_v55 = vadd.f32 %v488_v17, %v301_v53  ;;  %v623_v56 = vsel %vm559_vm8, %v527_v42, %v591_v47  ;;  %v706_v17 = vsel %vm693_vm4, %v3523_v6, -inf  ;;  %v436_v47 = vcombine.high %v3448_v51, %v3448_v51 }
 0x2ba   :  { %v3507_v57 = vsel %vm3499_vm7, %v623_v56, -1e+30 }
 0x2bb   :  { %v592_v58 = vmul.f32 0.2, %v528_v55  ;;  %v700_v59 = vsel %vm693_vm4, %v3507_v57, -inf  ;;  %vm560_vm11 = vcmp.gt.f32.partialorder %v528_v55, 0.0 }
 0x2bc   :  { %701 = vmax.xlane.f32.xlu0 %v700_v59  ;;  %v312_v61 = vpop.permute.xlu1 %311  ;;  %v384_v59 = vpop.permute.xlu0 %383 }
 0x2bd   :  { %v530_v62 = vadd.f32 %v492_v33, %v312_v61  ;;  %v624_v63 = vsel %vm560_vm11, %v528_v55, %v592_v58  ;;  %v450_v58 = vrot.slane %v436_v47, %v3457_v10 }
 0x2be   :  { %v3517_v1 = vsel %vm3511_vm10, %v624_v63, -1e+30 }
 0x2bf   :  { %v594_v2 = vmul.f32 0.2, %v530_v62  ;;  %v703_v3 = vsel %vm693_vm4, %v3517_v1, -inf  ;;  %vm562_vm12 = vcmp.gt.f32.partialorder %v530_v62, 0.0 }
 0x2c0   :  { %704 = vmax.xlane.f32.xlu0 %v703_v3  ;;  %v316_v4 = vpop.permute.xlu1 %315  ;;  %v452_v3 = vcombine.high %v450_v58, %v450_v58 }
 0x2c1   :  { %v531_v7 = vadd.f32 %v492_v33, %v316_v4  ;;  %v626_v8 = vsel %vm562_vm12, %v530_v62, %v594_v2  ;;  %v466_v4 = vrot.slane %v450_v58, %v3457_v10 }
 0x2c2   :  { %v3529_v15 = vsel %vm3491_vm5, %v626_v8, -1e+30 }
 0x2c3   :  { %v595_v16 = vmul.f32 0.2, %v531_v7  ;;  %v709_v18 = vsel %vm693_vm4, %v3529_v15, -inf  ;;  %vm563_vm13 = vcmp.gt.f32.partialorder %v531_v7, 0.0 }
 0x2c4   :  { %707 = vmax.xlane.f32.xlu0 %v706_v17  ;;  %710 = vmax.xlane.f32.xlu1 %v709_v18  ;;  %v320_v19 = vpop.permute.xlu1 %319 }
 0x2c5   :  { %v532_v20 = vadd.f32 %v492_v33, %v320_v19  ;;  %v627_v23 = vsel %vm563_vm13, %v531_v7, %v595_v16  ;;  %v483_v33 = vcombine.high %v3474_v22, %v3474_v22  ;;  %v373_v16 = vpop.permute.xlu0 %372 }
 0x2c6   :  { %v3537_v13 = vsel %vm3499_vm7, %v627_v23, -1e+30  ;;  %v3577_v23 = vrot.slane %v466_v4, %v3450_v52 }
 0x2c7   :  { %v596_v28 = vmul.f32 0.2, %v532_v20  ;;  %v712_v29 = vsel %vm693_vm4, %v3537_v13, -inf  ;;  %vm564_vm14 = vcmp.gt.f32.partialorder %v532_v20, 0.0  ;;  %v500_v53 = vrot.slane %v483_v33, %v3450_v52 }
 0x2c8   :  { %713 = vmax.xlane.f32.xlu0 %v712_v29  ;;  %v327_v30 = vpop.permute.xlu1 %326 }
 0x2c9   :  { %v533_v32 = vadd.f32 %v496_v25, %v327_v30  ;;  %v628_v34 = vsel %vm564_vm14, %v532_v20, %v596_v28  ;;  %v3574_v20 = vrot.slane %v452_v3, %v3457_v10  ;;  %v482_v3 = vcombine.high %v466_v4, %v466_v4 }
 0x2ca   :  { %v3544_v36 = vsel %vm3511_vm10, %v628_v34, -1e+30 }
 0x2cb   :  { %v597_v37 = vmul.f32 0.2, %v533_v32  ;;  %v715_v38 = vsel %vm693_vm4, %v3544_v36, -inf  ;;  %vm565_vm15 = vcmp.gt.f32.partialorder %v533_v32, 0.0  ;;  %v3588_v10 = vrot.slane %v3574_v20, %v3450_v52 }
 0x2cc   :  { %716 = vmax.xlane.f32.xlu1 %v715_v38  ;;  %v331_v41 = vpop.permute.xlu1 %330  ;;  %v392_v38 = vpop.permute.xlu0 %391 }
 0x2cd   :  { %v534_v42 = vadd.f32 %v496_v25, %v331_v41  ;;  %v629_v44 = vsel %vm565_vm15, %v533_v32, %v597_v37  ;;  %v541_v32 = vadd.f32 %v3577_v23, %v365_v40  ;;  %v545_v40 = vadd.f32 %v3588_v10, %v384_v59 }
 0x2ce   :  { %v3554_v49 = vsel %vm3476_vm2, %v629_v44, -1e+30  ;;  %v543_v59 = vadd.f32 %v3577_v23, %v373_v16 }
 0x2cf   :  { %v598_v50 = vmul.f32 0.2, %v534_v42  ;;  %v718_v22 = vsel %vm693_vm4, %v3554_v49, -inf  ;;  %vm566_vm0 = vcmp.gt.f32.partialorder %v534_v42, 0.0  ;;  %v605_v47 = vmul.f32 0.2, %v541_v32 }
 0x2d0   :  { %719 = vmax.xlane.f32.xlu0 %v718_v22  ;;  %v346_v54 = vpop.permute.xlu1 %345  ;;  %vm573_vm11 = vcmp.gt.f32.partialorder %v541_v32, 0.0  ;;  %v609_v58 = vmul.f32 0.2, %v545_v40  ;;  %vm577_vm13 = vcmp.gt.f32.partialorder %v545_v40, 0.0  ;;  %vm575_vm15 = vcmp.gt.f32.partialorder %v543_v59, 0.0 }
 0x2d1   :  { %v537_v55 = vadd.f32 %v500_v53, %v346_v54  ;;  %v630_v56 = vsel %vm566_vm0, %v534_v42, %v598_v50 }
 0x2d2   :  { %v3562_v51 = vsel %vm3491_vm5, %v630_v56, -1e+30  ;;  %v641_v16 = vsel %vm577_vm13, %v545_v40, %v609_v58 }
 0x2d3   :  { %v601_v61 = vmul.f32 0.2, %v537_v55  ;;  %v721_v62 = vsel %vm693_vm4, %v3562_v51, -inf  ;;  %vm569_vm3 = vcmp.gt.f32.partialorder %v537_v55, 0.0  ;;  %v3632_v40 = vsel %vm3476_vm2, %v641_v16, -1e+30 }
 0x2d4   :  { %722 = vmax.xlane.f32.xlu1 %v721_v62  ;;  %v350_v63 = vpop.permute.xlu1 %349 }
 0x2d5   :  { %v538_v0 = vadd.f32 %v500_v53, %v350_v63  ;;  %v633_v2 = vsel %vm569_vm3, %v537_v55, %v601_v61  ;;  %v403_v61 = vpop.permute.xlu0 %402  ;;  %v637_v63 = vsel %vm573_vm11, %v541_v32, %v605_v47  ;;  %v484_v32 = vcombine.high %v3574_v20, %v3574_v20 }
 0x2d6   :  { %v3569_v7 = vsel %vm3476_vm2, %v633_v2, -1e+30 }
 0x2d7   :  { %v602_v8 = vmul.f32 0.2, %v538_v0  ;;  %v730_v12 = vsel %vm693_vm4, %v3569_v7, -inf  ;;  %vm570_vm6 = vcmp.gt.f32.partialorder %v538_v0, 0.0 }
 0x2d8   :  { %731 = vmax.xlane.f32.xlu0 %v730_v12  ;;  %v335_v17 = vpop.permute.xlu1 %334 }
 0x2d9   :  { %v535_v18 = vadd.f32 %v496_v25, %v335_v17  ;;  %v634_v19 = vsel %vm570_vm6, %v538_v0, %v602_v8 }
 0x2da   :  { %v3581_v28 = vsel %vm3491_vm5, %v634_v19, -1e+30  ;;  %v3612_v19 = vsel %vm3476_vm2, %v637_v63, -1e+30 }
 0x2db   :  { %v599_v29 = vmul.f32 0.2, %v535_v18  ;;  %v733_v30 = vsel %vm693_vm4, %v3581_v28, -inf  ;;  %vm567_vm8 = vcmp.gt.f32.partialorder %v535_v18, 0.0 }
 0x2dc   :  { %734 = vmax.xlane.f32.xlu1 %v733_v30  ;;  %v339_v34 = vpop.permute.xlu1 %338 }
 0x2dd   :  { %v536_v33 = vadd.f32 %v496_v25, %v339_v34  ;;  %v631_v37 = vsel %vm567_vm8, %v535_v18, %v599_v29  ;;  %v547_v29 = vadd.f32 %v3588_v10, %v392_v38  ;;  %v3619_v34 = vrot.slane %v482_v3, %v3450_v52 }
 0x2de   :  { %v3592_v41 = vsel %vm3499_vm7, %v631_v37, -1e+30 }
 0x2df   :  { %v600_v42 = vmul.f32 0.2, %v536_v33  ;;  %v724_v44 = vsel %vm693_vm4, %v3592_v41, -inf  ;;  %vm568_vm9 = vcmp.gt.f32.partialorder %v536_v33, 0.0  ;;  %v549_v47 = vadd.f32 %v3619_v34, %v403_v61 }
 0x2e0   :  { %725 = vmax.xlane.f32.xlu0 %v724_v44  ;;  %v354_v25 = vpop.permute.xlu1 %353  ;;  %v742_v44 = vsel %vm693_vm4, %v3612_v19, -inf  ;;  %vm579_vm3 = vcmp.gt.f32.partialorder %v547_v29, 0.0 }
 0x2e1   :  { %v539_v50 = vadd.f32 %v500_v53, %v354_v25  ;;  %v632_v22 = vsel %vm568_vm9, %v536_v33, %v600_v42  ;;  %v422_v33 = vpop.permute.xlu0 %421  ;;  %v611_v25 = vmul.f32 0.2, %v547_v29  ;;  %vm581_vm8 = vcmp.gt.f32.partialorder %v549_v47, 0.0 }
 0x2e2   :  { %v3599_v54 = vsel %vm3511_vm10, %v632_v22, -1e+30 }
 0x2e3   :  { %v603_v55 = vmul.f32 0.2, %v539_v50  ;;  %v727_v56 = vsel %vm693_vm4, %v3599_v54, -inf  ;;  %vm571_vm12 = vcmp.gt.f32.partialorder %v539_v50, 0.0  ;;  %v643_v16 = vsel %vm579_vm3, %v547_v29, %v611_v25 }
 0x2e4   :  { %728 = vmax.xlane.f32.xlu1 %v727_v56  ;;  %v358_v62 = vpop.permute.xlu1 %357  ;;  %v3636_v56 = vrot.slane %v484_v32, %v3450_v52 }
 0x2e5   :  { %v540_v0 = vadd.f32 %v500_v53, %v358_v62  ;;  %v635_v2 = vsel %vm571_vm12, %v539_v50, %v603_v55  ;;  %v607_v53 = vmul.f32 0.2, %v543_v59  ;;  %v754_v62 = vsel %vm693_vm4, %v3632_v40, -inf }
 0x2e6   :  { %v3606_v8 = vsel %vm3499_vm7, %v635_v2, -1e+30  ;;  %v553_v2 = vadd.f32 %v3636_v56, %v422_v33 }
 0x2e7   :  { %v604_v12 = vmul.f32 0.2, %v540_v0  ;;  %v736_v17 = vsel %vm693_vm4, %v3606_v8, -inf  ;;  %vm572_vm14 = vcmp.gt.f32.partialorder %v540_v0, 0.0  ;;  %v639_v55 = vsel %vm575_vm15, %v543_v59, %v607_v53  ;;  %v411_v59 = vpop.permute.xlu0 %410 }
 0x2e8   :  { %737 = vmax.xlane.f32.xlu0 %v736_v17  ;;  %v369_v18 = vpop.permute.xlu1 %368  ;;  %v617_v33 = vmul.f32 0.2, %v553_v2  ;;  %vm585_vm11 = vcmp.gt.f32.partialorder %v553_v2, 0.0 }
 0x2e9   :  { %v542_v4 = vadd.f32 %v3577_v23, %v369_v18  ;;  %v636_v30 = vsel %vm572_vm14, %v540_v0, %v604_v12  ;;  %v613_v0 = vmul.f32 0.2, %v549_v47  ;;  %v3649_v12 = vsel %vm3499_vm7, %v639_v55, -1e+30 }
 0x2ea   :  { %v3623_v37 = vsel %vm3511_vm10, %v636_v30, -1e+30  ;;  %v748_v30 = vsel %vm693_vm4, %v3649_v12, -inf }
 0x2eb   :  { %v606_v42 = vmul.f32 0.2, %v542_v4  ;;  %v739_v38 = vsel %vm693_vm4, %v3623_v37, -inf  ;;  %vm574_vm0 = vcmp.gt.f32.partialorder %v542_v4, 0.0  ;;  %v645_v29 = vsel %vm581_vm8, %v549_v47, %v613_v0  ;;  %v430_v25 = vpop.permute.xlu0 %429 }
 0x2ec   :  { %743 = vmax.xlane.f32.xlu0 %v742_v44  ;;  %740 = vmax.xlane.f32.xlu1 %v739_v38  ;;  %v388_v20 = vpop.permute.xlu1 %387  ;;  %v551_v44 = vadd.f32 %v3619_v34, %v411_v59  ;;  %v555_v0 = vadd.f32 %v3636_v56, %v430_v25  ;;  %vm1143_vm8 = vcmask 64512  }
 0x2ed   :  { %v546_v50 = vadd.f32 %v3588_v10, %v388_v20  ;;  %v638_v22 = vsel %vm574_vm0, %v542_v4, %v606_v42 }
 0x2ee   :  { %v3640_v58 = vsel %vm3491_vm5, %v638_v22, -1e+30  ;;  %vm583_vm13 = vcmp.gt.f32.partialorder %v551_v44, 0.0  ;;  %vm587_vm15 = vcmp.gt.f32.partialorder %v555_v0, 0.0 }
 0x2ef   :  { %v610_v61 = vmul.f32 0.2, %v546_v50  ;;  %v745_v63 = vsel %vm693_vm4, %v3640_v58, -inf  ;;  %vm578_vm6 = vcmp.gt.f32.partialorder %v546_v50, 0.0 }
 0x2f0   :  { %755 = vmax.xlane.f32.xlu0 %v754_v62  ;;  %746 = vmax.xlane.f32.xlu1 %v745_v63  ;;  %v377_v3 = vpop.permute.xlu1 %376  ;;  %v649_v62 = vsel %vm585_vm11, %v553_v2, %v617_v33  ;;  %v615_v63 = vmul.f32 0.2, %v551_v44  ;;  %vm1273_vm11 = vcmask 130112  }
 0x2f1   :  { %v544_v17 = vadd.f32 %v3577_v23, %v377_v3  ;;  %v642_v18 = vsel %vm578_vm6, %v546_v50, %v610_v61  ;;  %v3662_v23 = vsel %vm3499_vm7, %v643_v16, -1e+30 }
 0x2f2   :  { %v3654_v53 = vsel %vm3491_vm5, %v642_v18, -1e+30  ;;  %v760_v55 = vsel %vm693_vm4, %v3662_v23, -inf }
 0x2f3   :  { %v608_v4 = vmul.f32 0.2, %v544_v17  ;;  %v757_v32 = vsel %vm693_vm4, %v3654_v53, -inf  ;;  %vm576_vm9 = vcmp.gt.f32.partialorder %v544_v17, 0.0 }
 0x2f4   :  { %749 = vmax.xlane.f32.xlu0 %v748_v30  ;;  %758 = vmax.xlane.f32.xlu1 %v757_v32  ;;  %v396_v42 = vpop.permute.xlu1 %395  ;;  %v3690_v30 = vsel %vm3476_vm2, %v649_v62, -1e+30  ;;  %v619_v32 = vmul.f32 0.2, %v555_v0 }
 0x2f5   :  { %v548_v38 = vadd.f32 %v3588_v10, %v396_v42  ;;  %v640_v20 = vsel %vm576_vm9, %v544_v17, %v608_v4  ;;  %v3676_v10 = vsel %vm3476_vm2, %v645_v29, -1e+30  ;;  %v647_v29 = vsel %vm583_vm13, %v551_v44, %v615_v63 }
 0x2f6   :  { %v3668_v50 = vsel %vm3511_vm10, %v640_v20, -1e+30  ;;  %v766_v16 = vsel %vm693_vm4, %v3676_v10, -inf  ;;  %v778_v25 = vsel %vm693_vm4, %v3690_v30, -inf  ;;  %v651_v62 = vsel %vm587_vm15, %v555_v0, %v619_v32 }
 0x2f7   :  { %v612_v22 = vmul.f32 0.2, %v548_v38  ;;  %v751_v61 = vsel %vm693_vm4, %v3668_v50, -inf  ;;  %vm580_vm12 = vcmp.gt.f32.partialorder %v548_v38, 0.0  ;;  %vm2216_vm9 = vcmask 1043456  }
 0x2f8   :  { %761 = vmax.xlane.f32.xlu0 %v760_v55  ;;  %752 = vmax.xlane.f32.xlu1 %v751_v61  ;;  %v407_v47 = vpop.permute.xlu1 %406  ;;  %v3703_v61 = vsel %vm3499_vm7, %v647_v29, -1e+30  ;;  %vm1533_vm13 = vcmask 261312   ;;  %vm1793_vm15 = vcmask 392512  }
 0x2f9   :  { %v550_v59 = vadd.f32 %v3619_v34, %v407_v47  ;;  %v644_v3 = vsel %vm580_vm12, %v548_v38, %v612_v22  ;;  %vm1403_vm12 = vcmask 195712  }
 0x2fa   :  { %v3682_v17 = vsel %vm3511_vm10, %v644_v3, -1e+30  ;;  %v772_v3 = vsel %vm693_vm4, %v3703_v61, -inf }
 0x2fb   :  { %v614_v18 = vmul.f32 0.2, %v550_v59  ;;  %v763_v4 = vsel %vm693_vm4, %v3682_v17, -inf  ;;  %vm582_vm14 = vcmp.gt.f32.partialorder %v550_v59, 0.0 }
 0x2fc   :  { %767 = vmax.xlane.f32.xlu0 %v766_v16  ;;  %764 = vmax.xlane.f32.xlu1 %v763_v4  ;;  %v426_v2 = vpop.permute.xlu1 %425 }
 0x2fd   :  { %v554_v33 = vadd.f32 %v3636_v56, %v426_v2  ;;  %v646_v42 = vsel %vm582_vm14, %v550_v59, %v614_v18  ;;  %vm1663_vm14 = vcmask 326912  }
 0x2fe   :  { %v3695_v38 = vsel %vm3491_vm5, %v646_v42, -1e+30 }
 0x2ff   :  { %v618_v20 = vmul.f32 0.2, %v554_v33  ;;  %v769_v22 = vsel %vm693_vm4, %v3695_v38, -inf  ;;  %vm586_vm0 = vcmp.gt.f32.partialorder %v554_v33, 0.0 }
 0x300   :  { %779 = vmax.xlane.f32.xlu0 %v778_v25  ;;  %770 = vmax.xlane.f32.xlu1 %v769_v22  ;;  %v415_v55 = vpop.permute.xlu1 %414 }
 0x301   :  { %v552_v44 = vadd.f32 %v3619_v34, %v415_v55  ;;  %v650_v47 = vsel %vm586_vm0, %v554_v33, %v618_v20  ;;  %v3716_v34 = vsel %vm3499_vm7, %v651_v62, -1e+30  ;;  %vm1923_vm0 = vcmask 458112  }
 0x302   :  { %v3708_v63 = vsel %vm3491_vm5, %v650_v47, -1e+30  ;;  %v784_v33 = vsel %vm693_vm4, %v3716_v34, -inf }
 0x303   :  { %v616_v59 = vmul.f32 0.2, %v552_v44  ;;  %v781_v18 = vsel %vm693_vm4, %v3708_v63, -inf  ;;  %vm584_vm3 = vcmp.gt.f32.partialorder %v552_v44, 0.0 }
 0x304   :  { %773 = vmax.xlane.f32.xlu0 %v772_v3  ;;  %782 = vmax.xlane.f32.xlu1 %v781_v18  ;;  %v434_v16 = vpop.permute.xlu1 %433 }
 0x305   :  { %v556_v0 = vadd.f32 %v3636_v56, %v434_v16  ;;  %v648_v4 = vsel %vm584_vm3, %v552_v44, %v616_v59  ;;  %vm2053_vm3 = vcmask 523712  }
 0x306   :  { %v3721_v2 = vsel %vm3511_vm10, %v648_v4, -1e+30 }
 0x307   :  { %v620_v32 = vmul.f32 0.2, %v556_v0  ;;  %v775_v42 = vsel %vm693_vm4, %v3721_v2, -inf  ;;  %vm588_vm6 = vcmp.gt.f32.partialorder %v556_v0, 0.0 }
 0x308   :  { %785 = vmax.xlane.f32.xlu0 %v784_v33  ;;  %776 = vmax.xlane.f32.xlu1 %v775_v42 }
 0x309   :  { %v652_v29 = vsel %vm588_vm6, %v556_v0, %v620_v32 }
 0x30a   :  { %v3729_v20 = vsel %vm3511_vm10, %v652_v29, -1e+30 }
 0x30b   :  { %v787_v56 = vsel %vm693_vm4, %v3729_v20, -inf }
 0x30c   :  { %788 = vmax.xlane.f32.xlu1 %v787_v56 }
 0x31d   :  { %3129 = vrot.lane.b32.xlu1 %v3421_v21, %s3319_s1 }
 0x31e   :  { %3124 = vrot.lane.b32.xlu0 %v3421_v21, %s3320_s2 }
 0x341   :  { %v696_v25 = vpop.xlane.xlu0 %695 }
 0x342   :  { %v790_v22 = vsub.f32 %v3487_v35, %v696_v25 }
 0x344   :  { %v822_v55 = vmul.f32 1.442695, %v790_v22 }
 0x345   :  { %v699_v44 = vpop.xlane.xlu1 %698 }
 0x346   :  { %3145 = vpow2.f32 %v822_v55  ;;  %v791_v47 = vsub.f32 %v3497_v45, %v699_v44 }
 0x348   :  { %v824_v62 = vmul.f32 1.442695, %v791_v47 }
 0x349   :  { %v702_v59 = vpop.xlane.xlu0 %701 }
 0x34a   :  { %3147 = vpow2.f32 %v824_v62  ;;  %v792_v3 = vsub.f32 %v3507_v57, %v702_v59 }
 0x34c   :  { %v826_v18 = vmul.f32 1.442695, %v792_v3 }
 0x34d   :  { %v705_v16 = vpop.xlane.xlu0 %704 }
 0x34e   :  { %3149 = vpow2.f32 %v826_v18  ;;  %v793_v0 = vsub.f32 %v3517_v1, %v705_v16 }
 0x350   :  { %v3741_v4 = vpop.eup %3145  ;;  %v828_v21 = vmul.f32 1.442695, %v793_v0 }
 0x351   :  { %v708_v32 = vpop.xlane.xlu0 %707  ;;  %v711_v35 = vpop.xlane.xlu1 %710  ;;  %v886_v33 = vsel %vm693_vm4, %v3741_v4, 0.0 }
 0x352   :  { %3151 = vpow2.f32 %v828_v21  ;;  %v794_v45 = vsub.f32 %v3523_v6, %v708_v32  ;;  %v795_v42 = vsub.f32 %v3529_v15, %v711_v35  ;;  %887 = vadd.xlane.f32.xlu0 %v886_v33 }
 0x354   :  { %v3747_v57 = vpop.eup %3147  ;;  %v830_v29 = vmul.f32 1.442695, %v794_v45  ;;  %v832_v56 = vmul.f32 1.442695, %v795_v42 }
 0x355   :  { %v714_v25 = vpop.xlane.xlu0 %713  ;;  %v889_v1 = vsel %vm693_vm4, %v3747_v57, 0.0 }
 0x356   :  { %3153 = vpow2.f32 %v830_v29  ;;  %v796_v22 = vsub.f32 %v3537_v13, %v714_v25  ;;  %890 = vadd.xlane.f32.xlu1 %v889_v1 }
 0x357   :  { %3155 = vpow2.f32 %v832_v56 }
 0x358   :  { %v3752_v55 = vpop.eup %3149  ;;  %v834_v44 = vmul.f32 1.442695, %v796_v22 }
 0x359   :  { %v717_v6 = vpop.xlane.xlu1 %716  ;;  %v892_v15 = vsel %vm693_vm4, %v3752_v55, 0.0 }
 0x35a   :  { %3157 = vpow2.f32 %v834_v44  ;;  %v797_v47 = vsub.f32 %v3544_v36, %v717_v6  ;;  %893 = vadd.xlane.f32.xlu0 %v892_v15 }
 0x35c   :  { %v3757_v62 = vpop.eup %3151  ;;  %v836_v59 = vmul.f32 1.442695, %v797_v47 }
 0x35d   :  { %v720_v3 = vpop.xlane.xlu0 %719  ;;  %v895_v13 = vsel %vm693_vm4, %v3757_v62, 0.0 }
 0x35e   :  { %3159 = vpow2.f32 %v836_v59  ;;  %v798_v18 = vsub.f32 %v3554_v49, %v720_v3  ;;  %896 = vadd.xlane.f32.xlu1 %v895_v13 }
 0x360   :  { %v3762_v16 = vpop.eup %3153  ;;  %v838_v0 = vmul.f32 1.442695, %v798_v18 }
 0x361   :  { %v3764_v21 = vpop.eup %3155  ;;  %v723_v32 = vpop.xlane.xlu1 %722  ;;  %v898_v36 = vsel %vm693_vm4, %v3762_v16, 0.0 }
 0x362   :  { %3161 = vpow2.f32 %v838_v0  ;;  %v799_v35 = vsub.f32 %v3562_v51, %v723_v32  ;;  %899 = vadd.xlane.f32.xlu0 %v898_v36  ;;  %v901_v33 = vsel %vm693_vm4, %v3764_v21, 0.0 }
 0x363   :  { %902 = vadd.xlane.f32.xlu1 %v901_v33 }
 0x364   :  { %v3771_v45 = vpop.eup %3157  ;;  %v840_v49 = vmul.f32 1.442695, %v799_v35 }
 0x365   :  { %v732_v42 = vpop.xlane.xlu0 %731  ;;  %v904_v29 = vsel %vm693_vm4, %v3771_v45, 0.0 }
 0x366   :  { %3163 = vpow2.f32 %v840_v49  ;;  %v802_v56 = vsub.f32 %v3569_v7, %v732_v42  ;;  %905 = vadd.xlane.f32.xlu0 %v904_v29 }
 0x368   :  { %v3776_v25 = vpop.eup %3159  ;;  %v846_v1 = vmul.f32 1.442695, %v802_v56 }
 0x369   :  { %v735_v51 = vpop.xlane.xlu1 %734  ;;  %v907_v22 = vsel %vm693_vm4, %v3776_v25, 0.0 }
 0x36a   :  { %3165 = vpow2.f32 %v846_v1  ;;  %v803_v44 = vsub.f32 %v3581_v28, %v735_v51  ;;  %908 = vadd.xlane.f32.xlu1 %v907_v22 }
 0x36c   :  { %v3781_v6 = vpop.eup %3161  ;;  %v848_v15 = vmul.f32 1.442695, %v803_v44 }
 0x36d   :  { %v726_v47 = vpop.xlane.xlu0 %725  ;;  %v910_v59 = vsel %vm693_vm4, %v3781_v6, 0.0 }
 0x36e   :  { %3167 = vpow2.f32 %v848_v15  ;;  %v800_v7 = vsub.f32 %v3592_v41, %v726_v47  ;;  %911 = vadd.xlane.f32.xlu0 %v910_v59 }
 0x370   :  { %v3786_v3 = vpop.eup %3163  ;;  %v842_v13 = vmul.f32 1.442695, %v800_v7 }
 0x371   :  { %v729_v18 = vpop.xlane.xlu1 %728  ;;  %v913_v0 = vsel %vm693_vm4, %v3786_v3, 0.0 }
 0x372   :  { %3169 = vpow2.f32 %v842_v13  ;;  %v801_v28 = vsub.f32 %v3599_v54, %v729_v18  ;;  %914 = vadd.xlane.f32.xlu1 %v913_v0 }
 0x374   :  { %v3791_v32 = vpop.eup %3165  ;;  %v844_v36 = vmul.f32 1.442695, %v801_v28 }
 0x375   :  { %v738_v35 = vpop.xlane.xlu0 %737  ;;  %v922_v33 = vsel %vm693_vm4, %v3791_v32, 0.0 }
 0x376   :  { %3171 = vpow2.f32 %v844_v36  ;;  %v804_v41 = vsub.f32 %v3606_v8, %v738_v35  ;;  %923 = vadd.xlane.f32.xlu0 %v922_v33 }
 0x378   :  { %v3796_v49 = vpop.eup %3167  ;;  %v850_v42 = vmul.f32 1.442695, %v804_v41 }
 0x379   :  { %v744_v29 = vpop.xlane.xlu0 %743  ;;  %v741_v56 = vpop.xlane.xlu1 %740  ;;  %v925_v54 = vsel %vm693_vm4, %v3796_v49, 0.0 }
 0x37a   :  { %3173 = vpow2.f32 %v850_v42  ;;  %v806_v1 = vsub.f32 %v3612_v19, %v744_v29  ;;  %v805_v51 = vsub.f32 %v3623_v37, %v741_v56  ;;  %926 = vadd.xlane.f32.xlu1 %v925_v54 }
 0x37c   :  { %v3802_v22 = vpop.eup %3169  ;;  %v854_v44 = vmul.f32 1.442695, %v806_v1  ;;  %v852_v15 = vmul.f32 1.442695, %v805_v51 }
 0x37d   :  { %v756_v8 = vpop.xlane.xlu0 %755  ;;  %v747_v47 = vpop.xlane.xlu1 %746  ;;  %v916_v59 = vsel %vm693_vm4, %v3802_v22, 0.0 }
 0x37e   :  { %3175 = vpow2.f32 %v854_v44  ;;  %v810_v7 = vsub.f32 %v3632_v40, %v756_v8  ;;  %v807_v13 = vsub.f32 %v3640_v58, %v747_v47  ;;  %917 = vadd.xlane.f32.xlu0 %v916_v59 }
 0x37f   :  { %3177 = vpow2.f32 %v852_v15 }
 0x380   :  { %v3808_v19 = vpop.eup %3171  ;;  %v862_v37 = vmul.f32 1.442695, %v810_v7  ;;  %v856_v18 = vmul.f32 1.442695, %v807_v13 }
 0x381   :  { %v750_v0 = vpop.xlane.xlu0 %749  ;;  %v759_v28 = vpop.xlane.xlu1 %758  ;;  %v919_v36 = vsel %vm693_vm4, %v3808_v19, 0.0 }
 0x382   :  { %3179 = vpow2.f32 %v862_v37  ;;  %v808_v35 = vsub.f32 %v3649_v12, %v750_v0  ;;  %v811_v33 = vsub.f32 %v3654_v53, %v759_v28  ;;  %920 = vadd.xlane.f32.xlu1 %v919_v36 }
 0x383   :  { %3181 = vpow2.f32 %v856_v18 }
 0x384   :  { %v3814_v40 = vpop.eup %3173  ;;  %v864_v58 = vmul.f32 1.442695, %v811_v33  ;;  %v858_v41 = vmul.f32 1.442695, %v808_v35 }
 0x385   :  { %v762_v42 = vpop.xlane.xlu0 %761  ;;  %v753_v29 = vpop.xlane.xlu1 %752  ;;  %v928_v56 = vsel %vm693_vm4, %v3814_v40, 0.0 }
 0x386   :  { %v809_v54 = vsub.f32 %v3668_v50, %v753_v29  ;;  %929 = vadd.xlane.f32.xlu0 %v928_v56  ;;  %3183 = vpow2.f32 %v864_v58  ;;  %v812_v53 = vsub.f32 %v3662_v23, %v762_v42 }
 0x387   :  { %3185 = vpow2.f32 %v858_v41 }
 0x388   :  { %v3819_v1 = vpop.eup %3175  ;;  %v860_v51 = vmul.f32 1.442695, %v809_v54  ;;  %v866_v37 = vmul.f32 1.442695, %v812_v53 }
 0x389   :  { %v3821_v12 = vpop.eup %3177  ;;  %v768_v44 = vpop.xlane.xlu0 %767  ;;  %v934_v8 = vsel %vm693_vm4, %v3819_v1, 0.0 }
 0x38a   :  { %v765_v15 = vpop.xlane.xlu1 %764  ;;  %v814_v47 = vsub.f32 %v3676_v10, %v768_v44  ;;  %935 = vadd.xlane.f32.xlu0 %v934_v8  ;;  %v931_v50 = vsel %vm693_vm4, %v3821_v12, 0.0  ;;  %3187 = vpow2.f32 %v860_v51 }
 0x38b   :  { %932 = vadd.xlane.f32.xlu1 %v931_v50  ;;  %v813_v23 = vsub.f32 %v3682_v17, %v765_v15 }
 0x38c   :  { %v3829_v59 = vpop.eup %3179  ;;  %v870_v7 = vmul.f32 1.442695, %v814_v47 }
 0x38d   :  { %v3831_v13 = vpop.eup %3181  ;;  %v780_v18 = vpop.xlane.xlu0 %779  ;;  %v946_v28 = vsel %vm693_vm4, %v3829_v59, 0.0  ;;  %v868_v17 = vmul.f32 1.442695, %v813_v23 }
 0x38e   :  { %v771_v0 = vpop.xlane.xlu1 %770  ;;  %3189 = vpow2.f32 %v870_v7  ;;  %v818_v10 = vsub.f32 %v3690_v30, %v780_v18  ;;  %947 = vadd.xlane.f32.xlu0 %v946_v28  ;;  %v937_v36 = vsel %vm693_vm4, %v3831_v13, 0.0 }
 0x38f   :  { %938 = vadd.xlane.f32.xlu1 %v937_v36  ;;  %v815_v33 = vsub.f32 %v3695_v38, %v771_v0  ;;  %3191 = vpow2.f32 %v866_v37 }
 0x390   :  { %v878_v35 = vmul.f32 1.442695, %v818_v10  ;;  %v3840_v58 = vpop.eup %3183 }
 0x391   :  { %v774_v41 = vpop.xlane.xlu0 %773  ;;  %v949_v30 = vsel %vm693_vm4, %v3840_v58, 0.0  ;;  %v3846_v54 = vpop.eup %3185  ;;  %v872_v53 = vmul.f32 1.442695, %v815_v33 }
 0x392   :  { %v783_v42 = vpop.xlane.xlu1 %782  ;;  %3193 = vpow2.f32 %v878_v35  ;;  %v816_v29 = vsub.f32 %v3703_v61, %v774_v41  ;;  %v940_v61 = vsel %vm693_vm4, %v3846_v54, 0.0 }
 0x393   :  { %v819_v56 = vsub.f32 %v3708_v63, %v783_v42  ;;  %950 = vadd.xlane.f32.xlu1 %v949_v30  ;;  %3195 = vpow2.f32 %v868_v17 }
 0x394   :  { %v874_v38 = vmul.f32 1.442695, %v816_v29  ;;  %v3852_v63 = vpop.eup %3187 }
 0x395   :  { %v880_v51 = vmul.f32 1.442695, %v819_v56  ;;  %v786_v44 = vpop.xlane.xlu0 %785 }
 0x396   :  { %v777_v15 = vpop.xlane.xlu1 %776  ;;  %v820_v8 = vsub.f32 %v3716_v34, %v786_v44 }
 0x397   :  { %v817_v47 = vsub.f32 %v3721_v2, %v777_v15  ;;  %3197 = vpow2.f32 %v880_v51  ;;  %941 = vadd.xlane.f32.xlu1 %v940_v61  ;;  %v943_v2 = vsel %vm693_vm4, %v3852_v63, 0.0 }
 0x398   :  { %v3854_v50 = vpop.eup %3189  ;;  %3199 = vpow2.f32 %v872_v53  ;;  %v882_v7 = vmul.f32 1.442695, %v820_v8 }
 0x399   :  { %3201 = vpow2.f32 %v874_v38  ;;  %v876_v37 = vmul.f32 1.442695, %v817_v47  ;;  %v958_v18 = vsel %vm693_vm4, %v3854_v50, 0.0  ;;  %v3861_v0 = vpop.eup %3191  ;;  %v3901_v47 = vpop.permute.xlu0 %3124 }
 0x39a   :  { %v789_v23 = vpop.xlane.xlu1 %788  ;;  %959 = vadd.xlane.f32.xlu0 %v958_v18  ;;  %3203 = vpow2.f32 %v882_v7  ;;  %v952_v35 = vsel %vm693_vm4, %v3861_v0, 0.0 }
 0x39b   :  { %v821_v34 = vsub.f32 %v3729_v20, %v789_v23  ;;  %944 = vadd.xlane.f32.xlu1 %v943_v2  ;;  %3205 = vpow2.f32 %v876_v37 }
 0x39c   :  { %v3863_v28 = vpop.eup %3193 }
 0x39d   :  { %v884_v10 = vmul.f32 1.442695, %v821_v34  ;;  %v970_v36 = vsel %vm693_vm4, %v3863_v28, 0.0  ;;  %v3869_v20 = vpop.eup %3195 }
 0x39e   :  { %971 = vadd.xlane.f32.xlu0 %v970_v36  ;;  %v955_v41 = vsel %vm693_vm4, %v3869_v20, 0.0  ;;  %v3903_v61 = vpop.permute.xlu1 %3129  ;;  %v3101_v36 = vunpack.i.l.bf16 %v3455_v9 }
 0x39f   :  { %953 = vadd.xlane.f32.xlu1 %v952_v35  ;;  %3207 = vpow2.f32 %v884_v10  ;;  %v3102_v10 = vunpack.i.h.bf16 %v3455_v9 }
 0x3a1   :  { %v3871_v33 = vpop.eup %3197 }
 0x3a2   :  { %v3873_v17 = vpop.eup %3199  ;;  %v973_v42 = vsel %vm693_vm4, %v3871_v33, 0.0 }
 0x3a3   :  { %v3879_v29 = vpop.eup %3201  ;;  %956 = vadd.xlane.f32.xlu1 %v955_v41  ;;  %974 = vadd.xlane.f32.xlu0 %v973_v42  ;;  %v961_v30 = vsel %vm693_vm4, %v3873_v17, 0.0 }
 0x3a4   :  { %v3881_v56 = vpop.eup %3203  ;;  %v964_v53 = vsel %vm693_vm4, %v3879_v29, 0.0 }
 0x3a5   :  { %v3887_v51 = vpop.eup %3205  ;;  %v976_v38 = vsel %vm693_vm4, %v3881_v56, 0.0 }
 0x3a6   :  { %v967_v44 = vsel %vm693_vm4, %v3887_v51, 0.0 }
 0x3a7   :  { %962 = vadd.xlane.f32.xlu1 %v961_v30  ;;  %965 = vadd.xlane.f32.xlu0 %v964_v53  ;;  %v3087_v30 = vunpack.i.h.bf16 %v3438_v27  ;;  %v3086_v53 = vunpack.i.l.bf16 %v3438_v27 }
 0x3a9   :  { %v3893_v15 = vpop.eup %3207 }
 0x3aa   :  { %v979_v8 = vsel %vm693_vm4, %v3893_v15, 0.0 }
 0x3ab   :  { %977 = vadd.xlane.f32.xlu0 %v976_v38  ;;  %968 = vadd.xlane.f32.xlu1 %v967_v44 }
 0x3af   :  { %980 = vadd.xlane.f32.xlu0 %v979_v8 }
 0x3bc   :  { %3139 = vrot.lane.b32.xlu1 %v3427_v26, %s3319_s1 }
 0x3c5   :  { %3134 = vrot.lane.b32.xlu0 %v3427_v26, %s3320_s2 }
 0x3df   :  { %v888_v7 = vpop.xlane.xlu0 %887 }
 0x3e0   :  { %3209 = vrcp.f32 %v888_v7 }
 0x3e3   :  { %v891_v37 = vpop.xlane.xlu1 %890 }
 0x3e4   :  { %3211 = vrcp.f32 %v891_v37 }
 0x3e7   :  { %v894_v23 = vpop.xlane.xlu0 %893 }
 0x3e8   :  { %3213 = vrcp.f32 %v894_v23  ;;  %v3111_v23 = vunpack.i.l.bf16 %v3459_v11 }
 0x3ea   :  { %v3210_v18 = vpop.eup %3209 }
 0x3eb   :  { %v897_v34 = vpop.xlane.xlu1 %896  ;;  %v1014_v2 = vmul.f32 %v3210_v18, %v3741_v4  ;;  %v2980_v4 = vpack.c.bf16 %v3102_v10, %v3101_v36  ;;  %v3096_v36 = vunpack.i.l.bf16 %v3453_v5 }
 0x3ec   :  { %3215 = vrcp.f32 %v897_v34 }
 0x3ed   :  { %2800 = vmatprep.mubr.msk.f32.mxu0 %vm693_vm4, %v1014_v2 }
 0x3ee   :  { %v3212_v26 = vpop.eup %3211 }
 0x3ef   :  { %v1015_v35 = vmul.f32 %v3212_v26, %v3747_v57  ;;  %v900_v41 = vpop.xlane.xlu0 %899  ;;  %v2992_v57 = vpack.c.bf16 %v3087_v30, %v3086_v53 }
 0x3f0   :  { %3217 = vrcp.f32 %v900_v41  ;;  %v903_v42 = vpop.xlane.xlu1 %902 }
 0x3f1   :  { %3219 = vrcp.f32 %v903_v42  ;;  %2801 = vmatmul.mubr.msk.f32.vlgmr.msra.gmra.mrb[4].mxu0 %vm693_vm4, %v1015_v35 }
 0x3f2   :  { %v3214_v38 = vpop.eup %3213  ;;  %2979 = vmatpush3.bf16.msra.mxu0 %v3440_v31  ;;  %v3112_v31 = vunpack.i.h.bf16 %v3459_v11 }
 0x3f3   :  { %2981 = vmatprep.subr.bf16.mxu0 %v2980_v4  ;;  %v906_v9 = vpop.xlane.xlu0 %905  ;;  %v1016_v44 = vmul.f32 %v3214_v38, %v3752_v55 }
 0x3f4   :  { %3221 = vrcp.f32 %v906_v9  ;;  %v2996_v26 = vpack.c.bf16 %v3112_v31, %v3111_v23 }
 0x3f5   :  { %2803 = vmatprep.mubr.msk.f32.mxu0 %vm693_vm4, %v1016_v44 }
 0x3f6   :  { %v3216_v8 = vpop.eup %3215  ;;  %2983 = vmatpush3.bf16.msra.mxu0 %v2980_v4  ;;  %v3116_v4 = vunpack.i.l.bf16 %v3446_v48 }
 0x3f7   :  { %2993 = vmatprep.subr.bf16.mxu0 %v2992_v57  ;;  %v909_v7 = vpop.xlane.xlu1 %908  ;;  %v1017_v27 = vmul.f32 %v3216_v8, %v3757_v62  ;;  %v3097_v62 = vunpack.i.h.bf16 %v3453_v5 }
 0x3f8   :  { %3223 = vrcp.f32 %v909_v7 }
 0x3f9   :  { %2804 = vmatmul.mubr.msk.f32.gmra.mrb[6].mxu0 %vm693_vm4, %v1017_v27  ;;  %v3122_v27 = vunpack.i.h.bf16 %v3466_v14 }
 0x3fa   :  { %v3218_v37 = vpop.eup %3217 }
 0x3fb   :  { %v3220_v18 = vpop.eup %3219  ;;  %v912_v55 = vpop.xlane.xlu0 %911  ;;  %v1018_v34 = vmul.f32 %v3218_v37, %v3762_v16 }
 0x3fc   :  { %v1019_v2 = vmul.f32 %v3220_v18, %v3764_v21  ;;  %3225 = vrcp.f32 %v912_v55  ;;  %v3008_v21 = vpack.c.bf16 %v3097_v62, %v3096_v36  ;;  %v3131_v18 = vunpack.i.l.bf16 %v3903_v61 }
 0x3fd   :  { %2814 = vmatprep.mubr.msk.f32.mxu0 %vm693_vm4, %v1018_v34 }
 0x3fe   :  { %v3222_v10 = vpop.eup %3221  ;;  %2815 = vmatmul.mubr.msk.f32.vlgmr.msra.gmra.mrb[8].mxu0 %vm693_vm4, %v1019_v2 }
 0x3ff   :  { %2995 = vmatpush3.bf16.msra.mxu0 %v2992_v57  ;;  %v915_v35 = vpop.xlane.xlu1 %914  ;;  %v1020_v11 = vmul.f32 %v3222_v10, %v3771_v45  ;;  %v3117_v45 = vunpack.i.h.bf16 %v3446_v48  ;;  %v3126_v57 = vunpack.i.l.bf16 %v3901_v47 }
 0x400   :  { %2997 = vmatprep.subr.bf16.mxu0 %v2996_v26  ;;  %3227 = vrcp.f32 %v915_v35 }
 0x401   :  { %2817 = vmatprep.mubr.msk.f32.mxu0 %vm693_vm4, %v1020_v11  ;;  %v3004_v8 = vpack.c.bf16 %v3117_v45, %v3116_v4 }
 0x402   :  { %v3224_v16 = vpop.eup %3223 }
 0x403   :  { %2999 = vmatpush3.bf16.msra.mxu0 %v2996_v26  ;;  %v924_v41 = vpop.xlane.xlu0 %923  ;;  %v1021_v42 = vmul.f32 %v3224_v16, %v3776_v25  ;;  %v3127_v25 = vunpack.i.h.bf16 %v3901_v47 }
 0x404   :  { %3229 = vrcp.f32 %v924_v41  ;;  %3009 = vmatprep.subr.bf16.mxu0 %v3008_v21 }
 0x405   :  { %2818 = vmatmul.mubr.msk.f32.gmra.mrb[10].mxu0 %vm693_vm4, %v1021_v42  ;;  %v3016_v37 = vpack.c.bf16 %v3127_v25, %v3126_v57 }
 0x406   :  { %v3226_v5 = vpop.eup %3225 }
 0x407   :  { %v927_v30 = vpop.xlane.xlu1 %926  ;;  %v1022_v53 = vmul.f32 %v3226_v5, %v3781_v6 }
 0x408   :  { %3231 = vrcp.f32 %v927_v30 }
 0x409   :  { %2828 = vmatprep.mubr.msk.f32.mxu1 %vm693_vm4, %v1022_v53 }
 0x40a   :  { %v3228_v38 = vpop.eup %3227 }
 0x40b   :  { %v1023_v9 = vmul.f32 %v3228_v38, %v3786_v3  ;;  %v918_v44 = vpop.xlane.xlu0 %917  ;;  %v3121_v3 = vunpack.i.l.bf16 %v3466_v14 }
 0x40c   :  { %3233 = vrcp.f32 %v918_v44 }
 0x40d   :  { %2829 = vmatmul.mubr.msk.f32.vlgmr.msra.gmra.mrb[4].mxu1 %vm693_vm4, %v1023_v9 }
 0x40e   :  { %v3230_v6 = vpop.eup %3229  ;;  %3003 = vmatpush3.bf16.msra.mxu1 %v3443_v43  ;;  %v3132_v43 = vunpack.i.h.bf16 %v3903_v61 }
 0x40f   :  { %3005 = vmatprep.subr.bf16.mxu1 %v3004_v8  ;;  %v921_v7 = vpop.xlane.xlu1 %920  ;;  %v1026_v48 = vmul.f32 %v3230_v6, %v3791_v32  ;;  %v3012_v32 = vpack.c.bf16 %v3122_v27, %v3121_v3 }
 0x410   :  { %3235 = vrcp.f32 %v921_v7  ;;  %v3024_v10 = vpack.c.bf16 %v3132_v43, %v3131_v18 }
 0x411   :  { %2842 = vmatprep.mubr.msk.f32.mxu0 %vm693_vm4, %v1026_v48 }
 0x412   :  { %v3232_v31 = vpop.eup %3231  ;;  %3007 = vmatpush3.bf16.msra.mxu1 %v3004_v8 }
 0x413   :  { %v1027_v47 = vmul.f32 %v3232_v31, %v3796_v49  ;;  %3017 = vmatprep.subr.bf16.mxu1 %v3016_v37  ;;  %v930_v23 = vpop.xlane.xlu0 %929 }
 0x414   :  { %3237 = vrcp.f32 %v930_v23 }
 0x415   :  { %2843 = vmatmul.mubr.msk.f32.vlgmr.msra.gmra.mrb[12].mxu0 %vm693_vm4, %v1027_v47 }
 0x416   :  { %v3234_v55 = vpop.eup %3233  ;;  %3011 = vmatpush3.bf16.msra.mxu0 %v3008_v21 }
 0x417   :  { %3013 = vmatprep.subr.bf16.mxu0 %v3012_v32  ;;  %v936_v14 = vpop.xlane.xlu0 %935  ;;  %v1024_v34 = vmul.f32 %v3234_v55, %v3802_v22 }
 0x418   :  { %3239 = vrcp.f32 %v936_v14  ;;  %v933_v2 = vpop.xlane.xlu1 %932 }
 0x419   :  { %3241 = vrcp.f32 %v933_v2  ;;  %2831 = vmatprep.mubr.msk.f32.mxu1 %vm693_vm4, %v1024_v34 }
 0x41a   :  { %v3236_v49 = vpop.eup %3235  ;;  %3015 = vmatpush3.bf16.msra.mxu0 %v3012_v32 }
 0x41b   :  { %3025 = vmatprep.subr.bf16.mxu0 %v3024_v10  ;;  %v948_v62 = vpop.xlane.xlu0 %947  ;;  %v1025_v61 = vmul.f32 %v3236_v49, %v3808_v19 }
 0x41c   :  { %3243 = vrcp.f32 %v948_v62  ;;  %v939_v36 = vpop.xlane.xlu1 %938 }
 0x41d   :  { %3245 = vrcp.f32 %v939_v36  ;;  %2832 = vmatmul.mubr.msk.f32.gmra.mrb[6].mxu1 %vm693_vm4, %v1025_v61 }
 0x41e   :  { %v3238_v26 = vpop.eup %3237 }
 0x41f   :  { %v1028_v22 = vmul.f32 %v3238_v26, %v3814_v40 }
 0x420   :  { %v951_v35 = vpop.xlane.xlu1 %950 }
 0x421   :  { %3247 = vrcp.f32 %v951_v35  ;;  %2845 = vmatprep.mubr.msk.f32.mxu0 %vm693_vm4, %v1028_v22 }
 0x422   :  { %v3240_v11 = vpop.eup %3239 }
 0x423   :  { %v3242_v16 = vpop.eup %3241  ;;  %v1030_v21 = vmul.f32 %v3240_v11, %v3819_v1 }
 0x424   :  { %v942_v41 = vpop.xlane.xlu1 %941  ;;  %v1029_v42 = vmul.f32 %v3242_v16, %v3821_v12 }
 0x425   :  { %3249 = vrcp.f32 %v942_v41  ;;  %2856 = vmatprep.mubr.msk.f32.mxu1 %vm693_vm4, %v1030_v21 }
 0x426   :  { %v3244_v19 = vpop.eup %3243  ;;  %2846 = vmatmul.mubr.msk.f32.gmra.mrb[14].mxu0 %vm693_vm4, %v1029_v42 }
 0x427   :  { %v3246_v5 = vpop.eup %3245  ;;  %v960_v30 = vpop.xlane.xlu0 %959  ;;  %v1034_v40 = vmul.f32 %v3244_v19, %v3829_v59 }
 0x428   :  { %v1031_v53 = vmul.f32 %v3246_v5, %v3831_v13  ;;  %3251 = vrcp.f32 %v960_v30  ;;  %v945_v45 = vpop.xlane.xlu1 %944 }
 0x429   :  { %3253 = vrcp.f32 %v945_v45  ;;  %2870 = vmatprep.mubr.msk.f32.mxu0 %vm693_vm4, %v1034_v40 }
 0x42a   :  { %2857 = vmatmul.mubr.msk.f32.vlgmr.msra.gmra.mrb[8].mxu1 %vm693_vm4, %v1031_v53 }
 0x42b   :  { %v3248_v1 = vpop.eup %3247  ;;  %3019 = vmatpush3.bf16.msra.mxu1 %v3016_v37  ;;  %v972_v12 = vpop.xlane.xlu0 %971 }
 0x42c   :  { %v1035_v4 = vmul.f32 %v3248_v1, %v3840_v58  ;;  %v954_v38 = vpop.xlane.xlu1 %953 }
 0x42d   :  { %3255 = vrcp.f32 %v954_v38 }
 0x42e   :  { %2871 = vmatmul.mubr.msk.f32.vlgmr.msra.gmra.mrb[16].mxu0 %vm693_vm4, %v1035_v4  ;;  %3257 = vrcp.f32 %v972_v12 }
 0x42f   :  { %v3250_v9 = vpop.eup %3249  ;;  %3027 = vmatpush3.bf16.msra.mxu0 %v3024_v10 }
 0x430   :  { %v975_v59 = vpop.xlane.xlu0 %974  ;;  %v957_v13 = vpop.xlane.xlu1 %956  ;;  %v1032_v44 = vmul.f32 %v3250_v9, %v3846_v54 }
 0x431   :  { %3259 = vrcp.f32 %v957_v13 }
 0x432   :  { %v3252_v25 = vpop.eup %3251  ;;  %2859 = vmatprep.mubr.msk.f32.mxu1 %vm693_vm4, %v1032_v44  ;;  %3261 = vrcp.f32 %v975_v59 }
 0x433   :  { %v3254_v57 = vpop.eup %3253  ;;  %v1038_v8 = vmul.f32 %v3252_v25, %v3854_v50 }
 0x434   :  { %v966_v6 = vpop.xlane.xlu0 %965  ;;  %v963_v58 = vpop.xlane.xlu1 %962  ;;  %v1033_v7 = vmul.f32 %v3254_v57, %v3852_v63 }
 0x436   :  { %2860 = vmatmul.mubr.msk.f32.gmra.mrb[10].mxu1 %vm693_vm4, %v1033_v7 }
 0x437   :  { %v3256_v48 = vpop.eup %3255  ;;  %2884 = vmatprep.mubr.msk.f32.mxu1 %vm693_vm4, %v1038_v8 }
 0x438   :  { %v978_v27 = vpop.xlane.xlu0 %977  ;;  %v969_v54 = vpop.xlane.xlu1 %968  ;;  %v1036_v3 = vmul.f32 %v3256_v48, %v3861_v0 }
 0x439   :  { %3263 = vrcp.f32 %v978_v27  ;;  %v3258_v37 = vpop.eup %3257 }
 0x43a   :  { %3265 = vrcp.f32 %v963_v58  ;;  %2873 = vmatprep.mubr.msk.f32.mxu0 %vm693_vm4, %v1036_v3  ;;  %v1042_v18 = vmul.f32 %v3258_v37, %v3863_v28  ;;  %v2098_v3 = vld [vmem:[%s4105_s5 + $0x8] sm:$0xff]  ;;  %v2099_v37 = vld [vmem:[%s4105_s5 + $0x10] sm:$0xff] }
 0x43b   :  { %3267 = vrcp.f32 %v966_v6  ;;  %v3260_v50 = vpop.eup %3259 }
 0x43c   :  { %v981_v31 = vpop.xlane.xlu0 %980  ;;  %v3140_v47 = vpop.permute.xlu1 %3139  ;;  %v1037_v43 = vmul.f32 %v3260_v50, %v3869_v20 }
 0x43d   :  { %3269 = vrcp.f32 %v981_v31  ;;  %v3142_v63 = vunpack.i.h.bf16 %v3140_v47  ;;  %v3141_v23 = vunpack.i.l.bf16 %v3140_v47  ;;  %v3262_v0 = vpop.eup %3261  ;;  %v2100_v31 = vld [vmem:[%s4105_s5 + $0x18] sm:$0xff] }
 0x43e   :  { %3271 = vrcp.f32 %v969_v54  ;;  %2874 = vmatmul.mubr.msk.f32.gmra.mrb[18].mxu0 %vm693_vm4, %v1037_v43  ;;  %v1043_v10 = vmul.f32 %v3262_v0, %v3871_v33  ;;  %v2097_v54 = vld [vmem:[%s4105_s5] sm:$0xff]  ;;  %v3036_v47 = vpack.c.bf16 %v2100_v31, %v2099_v37 }
 0x43f   :  { %v3028_v32 = vpack.c.bf16 %v3142_v63, %v3141_v23  ;;  %2898 = vmatprep.mubr.msk.f32.mxu0 %vm693_vm4, %v1042_v18  ;;  %v3032_v50 = vpack.c.bf16 %v2098_v3, %v2097_v54  ;;  %v2101_v63 = vld [vmem:[%s4105_s5 + $0x20] sm:$0xff]  ;;  %v2102_v23 = vld [vmem:[%s4105_s5 + $0x28] sm:$0xff]  ;;  %v2103_v18 = vld [vmem:[%s4105_s5 + $0x30] sm:$0xff] }
 0x440   :  { %v3135_v55 = vpop.permute.xlu0 %3134  ;;  %v3040_v43 = vpack.c.bf16 %v2102_v23, %v2101_v63 }
 0x441   :  { %v3137_v14 = vunpack.i.h.bf16 %v3135_v55  ;;  %v3136_v34 = vunpack.i.l.bf16 %v3135_v55  ;;  %3029 = vmatprep.subr.bf16.mxu0 %v3028_v32  ;;  %v2202_v55 = vld [vmem:[%s4106_s6] sm:$0xf] }
 0x442   :  { %3031 = vmatpush3.bf16.msra.mxu0 %v3028_v32  ;;  %v2104_v32 = vld [vmem:[%s4105_s5 + $0x38] sm:$0xff] }
 0x443   :  { %v3264_v2 = vpop.eup %3263  ;;  %v3020_v49 = vpack.c.bf16 %v3137_v14, %v3136_v34  ;;  %v3044_v0 = vpack.c.bf16 %v2104_v32, %v2103_v18  ;;  %2926 = vmatprep.subr.msk.mxu0 %vm2216_vm9, %v2202_v55 }
 0x444   :  { %v3266_v62 = vpop.eup %3265  ;;  %v1044_v20 = vmul.f32 %v3264_v2, %v3881_v56 }
 0x445   :  { %v3268_v61 = vpop.eup %3267  ;;  %3021 = vmatprep.subr.bf16.mxu1 %v3020_v49  ;;  %2899 = vmatmul.mubr.msk.f32.vlgmr.msra.gmra.mrb[20].mxu0 %vm693_vm4, %v1043_v10  ;;  %v1039_v36 = vmul.f32 %v3266_v62, %v3873_v17 }
 0x446   :  { %3023 = vmatpush3.bf16.msra.mxu1 %v3020_v49  ;;  %2901 = vmatprep.mubr.msk.f32.mxu0 %vm693_vm4, %v1044_v20  ;;  %v1040_v22 = vmul.f32 %v3268_v61, %v3879_v29 }
 0x447   :  { %v3270_v28 = vpop.eup %3269  ;;  %3033 = vmatprep.subr.bf16.mxu1 %v3032_v50  ;;  %2927 = vmatpush3.msk.msra.mxu0 %vm2216_vm9, %v2202_v55 }
 0x448   :  { %v3272_v26 = vpop.eup %3271  ;;  %v1045_v35 = vmul.f32 %v3270_v28, %v3893_v15 }
 0x449   :  { %2885 = vmatmul.mubr.msk.f32.vlgmr.msra.gmra.mrb[12].mxu1 %vm693_vm4, %v1039_v36  ;;  %v1041_v33 = vmul.f32 %v3272_v26, %v3887_v51 }
 0x44a   :  { %2887 = vmatprep.mubr.msk.f32.mxu1 %vm693_vm4, %v1040_v22  ;;  %2902 = vmatmul.mubr.msk.f32.gmra.mrb[22].mxu0 %vm693_vm4, %v1045_v35 }
 0x44b   :  { %3035 = vmatpush3.bf16.msra.mxu1 %v3032_v50 }
 0x44c   :  { %3037 = vmatprep.subr.bf16.mxu1 %v3036_v47 }
 0x44d   :  { %2888 = vmatmul.mubr.msk.f32.gmra.mrb[14].mxu1 %vm693_vm4, %v1041_v33 }
 0x44f   :  { %3039 = vmatpush3.bf16.msra.mxu1 %v3036_v47 }
 0x450   :  { %3041 = vmatprep.subr.bf16.mxu1 %v3040_v43 }
 0x453   :  { %3043 = vmatpush3.bf16.msra.mxu1 %v3040_v43 }
 0x454   :  { %3045 = vmatprep.subr.bf16.mxu1 %v3044_v0 }
 0x457   :  { %3047 = vmatpush3.bf16.msra.mxu1 %v3044_v0  ;;  %v3328_v0 = vmov 1  }
 0x458   :  { %3144 = vset.pattern.permute.xlu1 %v3328_v0  ;;  %3143 = vset.pattern.permute.xlu0 %v3328_v0 }
 0x4c4   :  { %v2802_v56 = vpop.f32.mrb[4].mxu0 }
 0x4c5   :  { %1145 = vst.msk [vmem:[#allocation2 + $0x8] sm:$0xff] %vm1143_vm8, %v2802_v56  ;;  %v1124_v11 = vpop.f32.mrb[5].mxu0 }
 0x4c6   :  { %1144 = vst.msk [vmem:[#allocation2] sm:$0xff] %vm1143_vm8, %v1124_v11 }
 0x4cc   :  { %v2805_v17 = vpop.f32.mrb[6].mxu0 }
 0x4cd   :  { %1147 = vst.msk [vmem:[#allocation2 + $0x18] sm:$0xff] %vm1143_vm8, %v2805_v17  ;;  %v1134_v29 = vpop.f32.mrb[7].mxu0 }
 0x4ce   :  { %1146 = vst.msk [vmem:[#allocation2 + $0x10] sm:$0xff] %vm1143_vm8, %v1134_v29 }
 0x4d1   :  { %v2816_v15 = vpop.f32.mrb[8].mxu0 }
 0x4d2   :  { %v1238_v16 = vpop.f32.mrb[9].mxu0 }
 0x4d8   :  { %v2819_v21 = vpop.f32.mrb[10].mxu0 }
 0x4d9   :  { %v1248_v41 = vpop.f32.mrb[11].mxu0 }
 0x4e0   :  { %v2830_v42 = vpop.f32.mrb[4].mxu1 }
 0x4e1   :  { %1393 = vrot.lane.b32.xlu1 %v2830_v42, %s3321_s17  ;;  %v1368_v19 = vpop.f32.mrb[5].mxu1 }
 0x4e2   :  { %1391 = vrot.lane.b32.xlu0 %v1368_v19, %s3321_s17 }
 0x4e8   :  { %v2844_v51 = vpop.f32.mrb[12].mxu0 }
 0x4e9   :  { %v1498_v5 = vpop.f32.mrb[13].mxu0 }
 0x4f0   :  { %v2833_v30 = vpop.f32.mrb[6].mxu1 }
 0x4f1   :  { %1397 = vrot.lane.b32.xlu0 %v2833_v30, %s3321_s17  ;;  %v1378_v40 = vpop.f32.mrb[7].mxu1 }
 0x4f2   :  { %1395 = vrot.lane.b32.xlu1 %v1378_v40, %s3321_s17 }
 0x4f6   :  { %1263 = vrot.lane.b32.xlu1 %v2816_v15, %s3322_s18 }
 0x4f9   :  { %v2847_v53 = vpop.f32.mrb[14].mxu0 }
 0x4fa   :  { %v1508_v45 = vpop.f32.mrb[15].mxu0 }
 0x4fd   :  { %v2858_v1 = vpop.f32.mrb[8].mxu1 }
 0x4fe   :  { %1653 = vrot.lane.b32.xlu0 %v2858_v1, %s3323_s19  ;;  %v1628_v12 = vpop.f32.mrb[9].mxu1 }
 0x501   :  { %v2872_v4 = vpop.f32.mrb[16].mxu0 }
 0x502   :  { %1261 = vrot.lane.b32.xlu0 %v1238_v16, %s3322_s18  ;;  %v1758_v38 = vpop.f32.mrb[17].mxu0 }
 0x506   :  { %1651 = vrot.lane.b32.xlu0 %v1628_v12, %s3323_s19 }
 0x509   :  { %v2861_v9 = vpop.f32.mrb[10].mxu1 }
 0x50a   :  { %1267 = vrot.lane.b32.xlu0 %v2819_v21, %s3322_s18  ;;  %1657 = vrot.lane.b32.xlu1 %v2861_v9, %s3323_s19  ;;  %v1638_v59 = vpop.f32.mrb[11].mxu1 }
 0x50e   :  { %1265 = vrot.lane.b32.xlu1 %v1248_v41, %s3322_s18 }
 0x511   :  { %v2875_v13 = vpop.f32.mrb[18].mxu0 }
 0x512   :  { %1655 = vrot.lane.b32.xlu1 %v1638_v59, %s3323_s19  ;;  %v1768_v44 = vpop.f32.mrb[19].mxu0 }
 0x516   :  { %1523 = vrot.lane.b32.xlu1 %v2844_v51, %s3324_s20 }
 0x518   :  { %v2900_v25 = vpop.f32.mrb[20].mxu0 }
 0x519   :  { %v2018_v57 = vpop.f32.mrb[21].mxu0 }
 0x51c   :  { %v2886_v8 = vpop.f32.mrb[12].mxu1 }
 0x51d   :  { %1913 = vrot.lane.b32.xlu0 %v2886_v8, %s3325_s21  ;;  %v1888_v6 = vpop.f32.mrb[13].mxu1  ;;  %v2903_v58 = vpop.f32.mrb[22].mxu0 }
 0x51e   :  { %1911 = vrot.lane.b32.xlu1 %v1888_v6, %s3325_s21  ;;  %v2028_v7 = vpop.f32.mrb[23].mxu0 }
 0x520   :  { %v2889_v48 = vpop.f32.mrb[14].mxu1 }
 0x521   :  { %1521 = vrot.lane.b32.xlu0 %v1498_v5, %s3324_s20  ;;  %v1898_v27 = vpop.f32.mrb[15].mxu1  ;;  %v2625_v5 = vld [vmem:[%s4107_s4] ss:$0 sm:$0xff] }
 0x522   :  { %1525 = vrot.lane.b32.xlu1 %v1508_v45, %s3324_s20 }
 0x525   :  { %1527 = vrot.lane.b32.xlu0 %v2847_v53, %s3324_s20 }
 0x526   :  { %1781 = vrot.lane.b32.xlu1 %v1758_v38, %s3326_s22 }
 0x529   :  { %1915 = vrot.lane.b32.xlu0 %v1898_v27, %s3325_s21 }
 0x52a   :  { %1787 = vrot.lane.b32.xlu1 %v2875_v13, %s3326_s22 }
 0x52d   :  { %1783 = vrot.lane.b32.xlu0 %v2872_v4, %s3326_s22 }
 0x52e   :  { %2041 = vrot.lane.b32.xlu1 %v2018_v57, %s3327_s29 }
 0x531   :  { %1785 = vrot.lane.b32.xlu0 %v1768_v44, %s3326_s22 }
 0x532   :  { %1917 = vrot.lane.b32.xlu1 %v2889_v48, %s3325_s21 }
 0x535   :  { %2043 = vrot.lane.b32.xlu0 %v2900_v25, %s3327_s29 }
 0x536   :  { %2047 = vrot.lane.b32.xlu1 %v2903_v58, %s3327_s29 }
 0x539   :  { %2045 = vrot.lane.b32.xlu0 %v2028_v7, %s3327_s29 }
 0x553   :  { %v1394_v14 = vpop.permute.xlu1 %1393 }
 0x554   :  { %v1392_v2 = vpop.permute.xlu0 %1391 }
 0x563   :  { %v1398_v49 = vpop.permute.xlu0 %1397 }
 0x564   :  { %v1396_v34 = vpop.permute.xlu1 %1395 }
 0x568   :  { %v1264_v10 = vpop.permute.xlu1 %1263 }
 0x569   :  { %1275 = vst.msk [vmem:[#allocation2 + $0x8] sm:$0xff] %vm1273_vm11, %v1264_v10 }
 0x56a   :  { %1405 = vst.msk [vmem:[#allocation2 + $0x8] sm:$0xff] %vm1403_vm12, %v1394_v14 }
 0x570   :  { %v1654_v62 = vpop.permute.xlu0 %1653 }
 0x574   :  { %v1262_v20 = vpop.permute.xlu0 %1261 }
 0x575   :  { %1274 = vst.msk [vmem:[#allocation2] sm:$0xff] %vm1273_vm11, %v1262_v20 }
 0x576   :  { %1404 = vst.msk [vmem:[#allocation2] sm:$0xff] %vm1403_vm12, %v1392_v2 }
 0x578   :  { %v1652_v61 = vpop.permute.xlu0 %1651 }
 0x57c   :  { %v1268_v28 = vpop.permute.xlu0 %1267  ;;  %v1658_v36 = vpop.permute.xlu1 %1657 }
 0x57d   :  { %1277 = vst.msk [vmem:[#allocation2 + $0x18] sm:$0xff] %vm1273_vm11, %v1268_v28 }
 0x57e   :  { %1407 = vst.msk [vmem:[#allocation2 + $0x18] sm:$0xff] %vm1403_vm12, %v1398_v49 }
 0x580   :  { %v1266_v26 = vpop.permute.xlu1 %1265 }
 0x581   :  { %1276 = vst.msk [vmem:[#allocation2 + $0x10] sm:$0xff] %vm1273_vm11, %v1266_v26 }
 0x582   :  { %1406 = vst.msk [vmem:[#allocation2 + $0x10] sm:$0xff] %vm1403_vm12, %v1396_v34  ;;  %vm2203_vm12 = vcmask 31744  }
 0x584   :  { %v1656_v22 = vpop.permute.xlu1 %1655 }
 0x588   :  { %v1524_v35 = vpop.permute.xlu1 %1523 }
 0x589   :  { %1535 = vst.msk [vmem:[#allocation2 + $0x8] sm:$0xff] %vm1533_vm13, %v1524_v35 }
 0x58a   :  { %1665 = vst.msk [vmem:[#allocation2 + $0x8] sm:$0xff] %vm1663_vm14, %v1654_v62 }
 0x58f   :  { %v1914_v33 = vpop.permute.xlu0 %1913 }
 0x590   :  { %v1912_v56 = vpop.permute.xlu1 %1911 }
 0x593   :  { %v1522_v11 = vpop.permute.xlu0 %1521 }
 0x594   :  { %1534 = vst.msk [vmem:[#allocation2] sm:$0xff] %vm1533_vm13, %v1522_v11  ;;  %v1526_v17 = vpop.permute.xlu1 %1525 }
 0x595   :  { %1536 = vst.msk [vmem:[#allocation2 + $0x10] sm:$0xff] %vm1533_vm13, %v1526_v17 }
 0x596   :  { %1664 = vst.msk [vmem:[#allocation2] sm:$0xff] %vm1663_vm14, %v1652_v61  ;;  %1666 = vst.msk [vmem:[#allocation2 + $0x10] sm:$0xff] %vm1663_vm14, %v1656_v22 }
 0x597   :  { %v1528_v29 = vpop.permute.xlu0 %1527 }
 0x598   :  { %1537 = vst.msk [vmem:[#allocation2 + $0x18] sm:$0xff] %vm1533_vm13, %v1528_v29  ;;  %v1782_v15 = vpop.permute.xlu1 %1781 }
 0x599   :  { %1794 = vst.msk [vmem:[#allocation2] sm:$0xff] %vm1793_vm15, %v1782_v15 }
 0x59a   :  { %1667 = vst.msk [vmem:[#allocation2 + $0x18] sm:$0xff] %vm1663_vm14, %v1658_v36 }
 0x59b   :  { %1924 = vst.msk [vmem:[#allocation2] sm:$0xff] %vm1923_vm0, %v1912_v56  ;;  %v1916_v16 = vpop.permute.xlu0 %1915 }
 0x59c   :  { %v1788_v21 = vpop.permute.xlu1 %1787 }
 0x59d   :  { %1797 = vst.msk [vmem:[#allocation2 + $0x18] sm:$0xff] %vm1793_vm15, %v1788_v21 }
 0x59f   :  { %v1784_v41 = vpop.permute.xlu0 %1783 }
 0x5a0   :  { %1795 = vst.msk [vmem:[#allocation2 + $0x8] sm:$0xff] %vm1793_vm15, %v1784_v41  ;;  %v2042_v42 = vpop.permute.xlu1 %2041 }
 0x5a1   :  { %2054 = vst.msk [vmem:[#allocation2] sm:$0xff] %vm2053_vm3, %v2042_v42 }
 0x5a2   :  { %1925 = vst.msk [vmem:[#allocation2 + $0x8] sm:$0xff] %vm1923_vm0, %v1914_v33 }
 0x5a3   :  { %v1786_v19 = vpop.permute.xlu0 %1785 }
 0x5a4   :  { %1796 = vst.msk [vmem:[#allocation2 + $0x10] sm:$0xff] %vm1793_vm15, %v1786_v19  ;;  %v1918_v51 = vpop.permute.xlu1 %1917 }
 0x5a5   :  { %1926 = vst.msk [vmem:[#allocation2 + $0x10] sm:$0xff] %vm1923_vm0, %v1916_v16  ;;  %1927 = vst.msk [vmem:[#allocation2 + $0x18] sm:$0xff] %vm1923_vm0, %v1918_v51 }
 0x5a7   :  { %v2044_v30 = vpop.permute.xlu0 %2043 }
 0x5a8   :  { %2055 = vst.msk [vmem:[#allocation2 + $0x8] sm:$0xff] %vm2053_vm3, %v2044_v30  ;;  %v2048_v40 = vpop.permute.xlu1 %2047  ;;  %v2058_v53 = vld [vmem:[#allocation2] sm:$0xff] }
 0x5a9   :  { %2057 = vst.msk [vmem:[#allocation2 + $0x18] sm:$0xff] %vm2053_vm3, %v2048_v40  ;;  %v2069_v45 = vadd.f32 %v2625_v5, %v2058_v53 }
 0x5ab   :  { %v2046_v1 = vpop.permute.xlu0 %2045  ;;  %v2077_v12 = vmin.f32 %v2069_v45, 0.0  ;;  %vm2073_vm6 = vcmp.gt.f32.partialorder %v2069_v45, 0.0 }
 0x5ac   :  { %2056 = vst.msk [vmem:[#allocation2 + $0x10] sm:$0xff] %vm2053_vm3, %v2046_v1 }
 0x5ad   :  { %v2081_v4 = vmul.f32 1.442695, %v2077_v12 }
 0x5af   :  { %3273 = vpow2.f32 %v2081_v4  ;;  %v2059_v38 = vld [vmem:[#allocation2 + $0x8] sm:$0xff] }
 0x5b0   :  { %v2070_v9 = vadd.f32 %v2625_v5, %v2059_v38  ;;  %v2061_v59 = vld [vmem:[#allocation2 + $0x18] sm:$0xff] }
 0x5b1   :  { %v2072_v13 = vadd.f32 %v2625_v5, %v2061_v59 }
 0x5b2   :  { %v2078_v44 = vmin.f32 %v2070_v9, 0.0  ;;  %vm2074_vm8 = vcmp.gt.f32.partialorder %v2070_v9, 0.0 }
 0x5b3   :  { %v2060_v25 = vld [vmem:[#allocation2 + $0x10] sm:$0xff]  ;;  %v2080_v57 = vmin.f32 %v2072_v13, 0.0  ;;  %vm2076_vm11 = vcmp.gt.f32.partialorder %v2072_v13, 0.0 }
 0x5b4   :  { %v2083_v8 = vmul.f32 1.442695, %v2078_v44  ;;  %v2071_v6 = vadd.f32 %v2625_v5, %v2060_v25 }
 0x5b5   :  { %v2087_v58 = vmul.f32 1.442695, %v2080_v57 }
 0x5b6   :  { %3275 = vpow2.f32 %v2083_v8  ;;  %v2079_v7 = vmin.f32 %v2071_v6, 0.0  ;;  %vm2075_vm9 = vcmp.gt.f32.partialorder %v2071_v6, 0.0 }
 0x5b7   :  { %3277 = vpow2.f32 %v2087_v58 }
 0x5b8   :  { %v2085_v48 = vmul.f32 1.442695, %v2079_v7 }
 0x5b9   :  { %v3274_v27 = vpop.eup %3273 }
 0x5ba   :  { %v2626_v54 = vadd.f32 -1.0, %v3274_v27  ;;  %3279 = vpow2.f32 %v2085_v48 }
 0x5bc   :  { %v2093_v3 = vsel %vm2073_vm6, %v2069_v45, %v2626_v54 }
 0x5bd   :  { %2920 = vmatprep.mubr.msk.f32.mxu1 %vm153_vm1, %v2093_v3 }
 0x5c0   :  { %v3276_v37 = vpop.eup %3275 }
 0x5c1   :  { %v3278_v50 = vpop.eup %3277  ;;  %v2627_v31 = vadd.f32 -1.0, %v3276_v37 }
 0x5c2   :  { %v2629_v23 = vadd.f32 -1.0, %v3278_v50 }
 0x5c3   :  { %v2094_v47 = vsel %vm2074_vm8, %v2070_v9, %v2627_v31 }
 0x5c4   :  { %v3280_v63 = vpop.eup %3279  ;;  %2921 = vmatmul.mubr.msk.f32.vlgmr.msra.gmra.mrb[16].mxu1 %vm153_vm1, %v2094_v47  ;;  %v2096_v32 = vsel %vm2076_vm11, %v2072_v13, %v2629_v23 }
 0x5c5   :  { %v2628_v43 = vadd.f32 -1.0, %v3280_v63 }
 0x5c7   :  { %v2095_v18 = vsel %vm2075_vm9, %v2071_v6, %v2628_v43 }
 0x5c8   :  { %2923 = vmatprep.mubr.msk.f32.mxu1 %vm153_vm1, %v2095_v18 }
 0x5c9   :  { %2924 = vmatmul.mubr.msk.f32.gmra.mrb[18].mxu1 %vm153_vm1, %v2096_v32 }
 0x697   :  { %v2922_v55 = vpop.f32.mrb[16].mxu1 }
 0x698   :  { %v2183_v14 = vpop.f32.mrb[17].mxu1 }
 0x699   :  { %v3048_v34 = vpack.c.bf16 %v2922_v55, %v2183_v14  ;;  %2928 = vmatprep.mubr.msk.f32.mxu0 %vm2203_vm12, %v2183_v14 }
 0x69a   :  { %2929 = vmatmul.mubr.msk.f32.vlgmr.msra.gmra.mrb[24].mxu0 %vm2203_vm12, %v2922_v55 }
 0x69b   :  { %3049 = vmatprep.subr.bf16.mxu0 %v3048_v34 }
 0x69c   :  { %v2925_v2 = vpop.f32.mrb[18].mxu1  ;;  %3051 = vmatpush3.bf16.msra.mxu0 %v3048_v34 }
 0x69d   :  { %v2193_v10 = vpop.f32.mrb[19].mxu1 }
 0x69e   :  { %v3052_v49 = vpack.c.bf16 %v2925_v2, %v2193_v10  ;;  %2931 = vmatprep.mubr.msk.f32.mxu0 %vm2203_vm12, %v2193_v10  ;;  %v2639_v10 = vld [vmem:[%s4108_s7] ss:$0 sm:$0xff] }
 0x69f   :  { %2932 = vmatmul.mubr.msk.f32.gmra.mrb[26].mxu0 %vm2203_vm12, %v2925_v2 }
 0x6a0   :  { %3053 = vmatprep.subr.bf16.mxu0 %v3052_v49 }
 0x6a1   :  { %3055 = vmatpush3.bf16.msra.mxu0 %v3052_v49 }
 0x76d   :  { %v2930_v62 = vpop.f32.mrb[24].mxu0 }
 0x76e   :  { %2344 = vperm.xlu1 %3144, %v2930_v62   ;;  %v2286_v20 = vpop.f32.mrb[25].mxu0 }
 0x76f   :  { %2339 = vperm.xlu0 %3143, %v2286_v20  }
 0x772   :  { %v2933_v61 = vpop.f32.mrb[26].mxu0 }
 0x773   :  { %2354 = vperm.xlu0 %3143, %v2933_v61   ;;  %v2296_v28 = vpop.f32.mrb[27].mxu0 }
 0x774   :  { %2349 = vperm.xlu1 %3144, %v2296_v28  }
 0x79d   :  { %2305 = vxpose.xlu1.b32.start [1/4] (short) (narrow) %v2286_v20, 8 }
 0x7a1   :  { %2306 = vxpose.xlu1.b32.cont [2/4] (short) (narrow) %v2930_v62, 8 }
 0x7a5   :  { %2307 = vxpose.xlu1.b32.cont [3/4] (short) (narrow) %v2296_v28, 8 }
 0x7a9   :  { %2308 = vxpose.xlu1.b32.end [4/4] (short) (narrow) %v2933_v61, 8 }
 0x7ed   :  { %v2345_v36 = vpop.permute.xlu1 %2344 }
 0x7ee   :  { %v2340_v22 = vpop.permute.xlu0 %2339 }
 0x7f2   :  { %v2355_v16 = vpop.permute.xlu0 %2354 }
 0x7f3   :  { %v2350_v26 = vpop.permute.xlu1 %2349 }
 0x81d   :  { %v2321_v35 = vpop.trf.xlu1 }
 0x81e   :  { %v2360_v33 = vrot.slane %v2321_v35, %v3450_v52 }
 0x820   :  { %v2362_v56 = vadd.f32 %v2360_v33, %v2345_v36  ;;  %v2361_v11 = vadd.f32 %v2360_v33, %v2340_v22  ;;  %v2363_v17 = vadd.f32 %v2360_v33, %v2350_v26  ;;  %v2364_v19 = vadd.f32 %v2360_v33, %v2355_v16 }
 0x822   :  { %vm2366_vm1 = vcmp.gt.f32.partialorder %v2362_v56, 0.0  ;;  %v2370_v29 = vmul.f32 0.2, %v2362_v56  ;;  %vm2365_vm13 = vcmp.gt.f32.partialorder %v2361_v11, 0.0  ;;  %v2369_v15 = vmul.f32 0.2, %v2361_v11 }
 0x823   :  { %v2371_v42 = vmul.f32 0.2, %v2363_v17  ;;  %vm2367_vm14 = vcmp.gt.f32.partialorder %v2363_v17, 0.0  ;;  %v2372_v40 = vmul.f32 0.2, %v2364_v19  ;;  %vm2368_vm15 = vcmp.gt.f32.partialorder %v2364_v19, 0.0 }
 0x824   :  { %v2374_v21 = vsel %vm2366_vm1, %v2362_v56, %v2370_v29  ;;  %v2373_v41 = vsel %vm2365_vm13, %v2361_v11, %v2369_v15 }
 0x825   :  { %v2378_v51 = vsel %vm3491_vm5, %v2374_v21, -1e+30  ;;  %v2377_v52 = vsel %vm3476_vm2, %v2373_v41, -1e+30  ;;  %v2375_v30 = vsel %vm2367_vm14, %v2363_v17, %v2371_v42  ;;  %v2376_v1 = vsel %vm2368_vm15, %v2364_v19, %v2372_v40 }
 0x826   :  { %v2384_v5 = vsel %vm693_vm4, %v2378_v51, -inf  ;;  %v2381_v53 = vsel %vm693_vm4, %v2377_v52, -inf  ;;  %v2379_v45 = vsel %vm3499_vm7, %v2375_v30, -1e+30  ;;  %v2380_v12 = vsel %vm3511_vm10, %v2376_v1, -1e+30 }
 0x827   :  { %2385 = vmax.xlane.f32.xlu0 %v2384_v5  ;;  %v2387_v39 = vsel %vm693_vm4, %v2379_v45, -inf  ;;  %v2390_v4 = vsel %vm693_vm4, %v2380_v12, -inf }
 0x82b   :  { %2382 = vmax.xlane.f32.xlu0 %v2381_v53 }
 0x82f   :  { %2388 = vmax.xlane.f32.xlu0 %v2387_v39 }
 0x833   :  { %2391 = vmax.xlane.f32.xlu0 %v2390_v4 }
 0x8b4   :  { %v2386_v24 = vpop.xlane.xlu0 %2385 }
 0x8b5   :  { %v2394_v38 = vsub.f32 %v2378_v51, %v2386_v24 }
 0x8b7   :  { %v2399_v9 = vmul.f32 1.442695, %v2394_v38 }
 0x8b8   :  { %v2383_v59 = vpop.xlane.xlu0 %2382 }
 0x8b9   :  { %3281 = vpow2.f32 %v2399_v9  ;;  %v2393_v13 = vsub.f32 %v2377_v52, %v2383_v59 }
 0x8bb   :  { %v2397_v44 = vmul.f32 1.442695, %v2393_v13 }
 0x8bc   :  { %v2389_v25 = vpop.xlane.xlu0 %2388 }
 0x8bd   :  { %3283 = vpow2.f32 %v2397_v44  ;;  %v2395_v46 = vsub.f32 %v2379_v45, %v2389_v25 }
 0x8bf   :  { %v2401_v57 = vmul.f32 1.442695, %v2395_v46 }
 0x8c0   :  { %v2392_v8 = vpop.xlane.xlu0 %2391 }
 0x8c1   :  { %3285 = vpow2.f32 %v2401_v57  ;;  %v2396_v6 = vsub.f32 %v2380_v12, %v2392_v8 }
 0x8c3   :  { %v3282_v58 = vpop.eup %3281  ;;  %v2403_v60 = vmul.f32 1.442695, %v2396_v6 }
 0x8c4   :  { %v2408_v7 = vsel %vm693_vm4, %v3282_v58, 0.0 }
 0x8c5   :  { %3287 = vpow2.f32 %v2403_v60  ;;  %2409 = vadd.xlane.f32.xlu0 %v2408_v7 }
 0x8c7   :  { %v3284_v48 = vpop.eup %3283 }
 0x8c8   :  { %v2405_v27 = vsel %vm693_vm4, %v3284_v48, 0.0 }
 0x8c9   :  { %2406 = vadd.xlane.f32.xlu0 %v2405_v27 }
 0x8cb   :  { %v3286_v54 = vpop.eup %3285 }
 0x8cc   :  { %v2411_v3 = vsel %vm693_vm4, %v3286_v54, 0.0 }
 0x8cd   :  { %2412 = vadd.xlane.f32.xlu0 %v2411_v3 }
 0x8cf   :  { %v3288_v37 = vpop.eup %3287 }
 0x8d0   :  { %v2414_v50 = vsel %vm693_vm4, %v3288_v37, 0.0 }
 0x8d1   :  { %2415 = vadd.xlane.f32.xlu1 %v2414_v50 }
 0x952   :  { %v2410_v31 = vpop.xlane.xlu0 %2409 }
 0x953   :  { %3289 = vrcp.f32 %v2410_v31 }
 0x956   :  { %v2407_v47 = vpop.xlane.xlu0 %2406 }
 0x957   :  { %3291 = vrcp.f32 %v2407_v47 }
 0x95a   :  { %v2413_v63 = vpop.xlane.xlu0 %2412 }
 0x95b   :  { %3293 = vrcp.f32 %v2413_v63 }
 0x95d   :  { %v3290_v43 = vpop.eup %3289 }
 0x95e   :  { %v2416_v23 = vpop.xlane.xlu1 %2415  ;;  %v2422_v0 = vmul.f32 %v3290_v43, %v3282_v58 }
 0x95f   :  { %3295 = vrcp.f32 %v2416_v23 }
 0x961   :  { %v3292_v18 = vpop.eup %3291 }
 0x962   :  { %v2421_v32 = vmul.f32 %v3292_v18, %v3284_v48 }
 0x964   :  { %2942 = vmatprep.mubr.msk.f32.mxu0 %vm693_vm4, %v2421_v32 }
 0x965   :  { %v3294_v55 = vpop.eup %3293  ;;  %2943 = vmatmul.mubr.msk.f32.vlgmr.msra.gmra.mrb[28].mxu0 %vm693_vm4, %v2422_v0 }
 0x966   :  { %v2423_v14 = vmul.f32 %v3294_v55, %v3286_v54 }
 0x968   :  { %2945 = vmatprep.mubr.msk.f32.mxu0 %vm693_vm4, %v2423_v14 }
 0x969   :  { %v3296_v34 = vpop.eup %3295 }
 0x96a   :  { %v2424_v2 = vmul.f32 %v3296_v34, %v3288_v37 }
 0x96c   :  { %2946 = vmatmul.mubr.msk.f32.gmra.mrb[30].mxu0 %vm693_vm4, %v2424_v2 }
 0xa38   :  { %v2944_v49 = vpop.f32.mrb[28].mxu0 }
 0xa39   :  { %v2516_v62 = vadd.f32 %v2944_v49, %v2639_v10  ;;  %v2510_v20 = vpop.f32.mrb[29].mxu0 }
 0xa3a   :  { %v2511_v61 = vadd.f32 %v2639_v10, %v2510_v20 }
 0xa3b   :  { %v2532_v28 = vsel %vm2203_vm12, %v2516_v62, -inf }
 0xa3c   :  { %2533 = vmax.xlane.f32.xlu0 %v2532_v28  ;;  %v2529_v26 = vsel %vm2203_vm12, %v2511_v61, -inf }
 0xa3f   :  { %v2947_v36 = vpop.f32.mrb[30].mxu0 }
 0xa40   :  { %2530 = vmax.xlane.f32.xlu0 %v2529_v26  ;;  %v2520_v22 = vpop.f32.mrb[31].mxu0  ;;  %v2526_v33 = vadd.f32 %v2947_v36, %v2639_v10 }
 0xa41   :  { %v2521_v35 = vadd.f32 %v2639_v10, %v2520_v22 }
 0xa42   :  { %v2538_v11 = vsel %vm2203_vm12, %v2526_v33, -inf }
 0xa43   :  { %v2535_v56 = vsel %vm2203_vm12, %v2521_v35, -inf }
 0xa44   :  { %2536 = vmax.xlane.f32.xlu0 %v2535_v56 }
 0xa48   :  { %2539 = vmax.xlane.f32.xlu0 %v2538_v11 }
 0xac9   :  { %v2534_v17 = vpop.xlane.xlu0 %2533 }
 0xaca   :  { %v2542_v29 = vsub.f32 %v2516_v62, %v2534_v17 }
 0xacc   :  { %v2547_v15 = vmul.f32 1.442695, %v2542_v29 }
 0xacd   :  { %v2531_v16 = vpop.xlane.xlu0 %2530 }
 0xace   :  { %3297 = vpow2.f32 %v2547_v15  ;;  %v2541_v21 = vsub.f32 %v2511_v61, %v2531_v16 }
 0xad0   :  { %v2545_v41 = vmul.f32 1.442695, %v2541_v21 }
 0xad1   :  { %v2537_v42 = vpop.xlane.xlu0 %2536 }
 0xad2   :  { %3299 = vpow2.f32 %v2545_v41  ;;  %v2543_v19 = vsub.f32 %v2521_v35, %v2537_v42 }
 0xad4   :  { %v2549_v51 = vmul.f32 1.442695, %v2543_v19 }
 0xad5   :  { %v2540_v5 = vpop.xlane.xlu0 %2539 }
 0xad6   :  { %3301 = vpow2.f32 %v2549_v51  ;;  %v2544_v52 = vsub.f32 %v2526_v33, %v2540_v5 }
 0xad8   :  { %v3298_v30 = vpop.eup %3297  ;;  %v2551_v40 = vmul.f32 1.442695, %v2544_v52 }
 0xad9   :  { %v2556_v53 = vsel %vm2203_vm12, %v3298_v30, 0.0 }
 0xada   :  { %3303 = vpow2.f32 %v2551_v40  ;;  %2557 = vadd.xlane.f32.xlu0 %v2556_v53 }
 0xadc   :  { %v3300_v45 = vpop.eup %3299 }
 0xadd   :  { %v2553_v1 = vsel %vm2203_vm12, %v3300_v45, 0.0 }
 0xade   :  { %2554 = vadd.xlane.f32.xlu0 %v2553_v1 }
 0xae0   :  { %v3302_v39 = vpop.eup %3301 }
 0xae1   :  { %v2559_v12 = vsel %vm2203_vm12, %v3302_v39, 0.0 }
 0xae2   :  { %2560 = vadd.xlane.f32.xlu0 %v2559_v12 }
 0xae4   :  { %v3304_v4 = vpop.eup %3303 }
 0xae5   :  { %v2562_v24 = vsel %vm2203_vm12, %v3304_v4, 0.0 }
 0xae6   :  { %2563 = vadd.xlane.f32.xlu0 %v2562_v24 }
 0xb67   :  { %v2558_v38 = vpop.xlane.xlu0 %2557 }
 0xb68   :  { %3305 = vlog2.f32 %v2558_v38 }
 0xb6b   :  { %v2555_v9 = vpop.xlane.xlu0 %2554 }
 0xb6c   :  { %3307 = vlog2.f32 %v2555_v9 }
 0xb6f   :  { %v2561_v59 = vpop.xlane.xlu0 %2560 }
 0xb70   :  { %3309 = vlog2.f32 %v2561_v59 }
 0xb72   :  { %v3306_v13 = vpop.eup %3305 }
 0xb73   :  { %v2568_v44 = vmul.f32 0.6931472, %v3306_v13  ;;  %v2564_v25 = vpop.xlane.xlu0 %2563 }
 0xb74   :  { %3311 = vlog2.f32 %v2564_v25 }
 0xb75   :  { %v2574_v46 = vsub.f32 %v2542_v29, %v2568_v44 }
 0xb76   :  { %v3308_v57 = vpop.eup %3307 }
 0xb77   :  { %2578 = vst.msk [vmem:[%s4109_s8 + $0x8] sm:$0xff] %vm2203_vm12, %v2574_v46  ;;  %v2566_v8 = vmul.f32 0.6931472, %v3308_v57 }
 0xb79   :  { %v2573_v6 = vsub.f32 %v2541_v21, %v2566_v8 }
 0xb7a   :  { %v3310_v58 = vpop.eup %3309 }
 0xb7b   :  { %2577 = vst.msk [vmem:[%s4109_s8] sm:$0xff] %vm2203_vm12, %v2573_v6  ;;  %v2570_v60 = vmul.f32 0.6931472, %v3310_v58 }
 0xb7d   :  { %v2575_v7 = vsub.f32 %v2543_v19, %v2570_v60 }
 0xb7e   :  { %v3312_v48 = vpop.eup %3311 }
 0xb7f   :  { %2579 = vst.msk [vmem:[%s4109_s8 + $0x10] sm:$0xff] %vm2203_vm12, %v2575_v7  ;;  %v2572_v27 = vmul.f32 0.6931472, %v3312_v48 }
 0xb81   :  { %v2576_v54 = vsub.f32 %v2544_v52, %v2572_v27 }
 0xb83   :  { %2580 = vst.msk [vmem:[%s4109_s8 + $0x18] sm:$0xff] %vm2203_vm12, %v2576_v54 }

</bundles_post_ra>
